<compile_context>
chip_gen: v7x
topology: tpu7x:2x2x1
jax: 0.10.0
libtpu: 0.0.40
codegen_flags: <defaults>
</compile_context>

<pallas_src>
import math
import functools

import jax
import jax.numpy as jnp
from jax import lax
from jax.experimental import pallas as pl
from jax.experimental.pallas import tpu as pltpu

# Matmul operand dtype (fp32 accumulate everywhere).
MATMUL_DTYPE = jnp.bfloat16


# ----------------------------------------------------------------------------
# Hardware-aware tiling / compiler-param helpers
# ----------------------------------------------------------------------------

@functools.lru_cache(maxsize=None)
def _vmem_cap_bytes():
    # Generation-aware VMEM capacity (v5e/v6e: 128 MiB, v7x: 64 MiB).
    try:
        return int(pltpu.get_tpu_info().vmem_capacity_bytes)
    except Exception:
        return 64 << 20   # conservative fallback (v7x-sized)


def _big_vmem():
    return _vmem_cap_bytes() >= (100 << 20)


def _row_tile(n):
    # Row (sublane) tile: full dim if small, else an 8-aligned tile.
    target = 512 if _big_vmem() else 256
    if n <= target:
        return n
    return max(8, (target // 8) * 8)


def _col_tile(f):
    # Output-feature (lane) tile: full dim if small, else a 128-aligned tile.
    target = 512 if _big_vmem() else 256
    if f <= target:
        return f
    return max(128, (target // 128) * 128)


def _k_tile(k, target=512):
    # Contraction tile must divide K exactly (partial K blocks would corrupt the
    # accumulator). Fall back to full K if no aligned divisor exists.
    if k <= target:
        return k
    for t in (512, 384, 256, 128):
        if k % t == 0:
            return t
    return k


def _cparams(dims, block_bytes):
    # Explicit scoped-VMEM budget: roomy multiple of the per-step block bytes,
    # clamped below the chip's physical VMEM.
    hi = (96 << 20) if _big_vmem() else (48 << 20)
    limit = int(min(max(6 * block_bytes, 32 << 20), hi))
    return pltpu.CompilerParams(dimension_semantics=dims, vmem_limit_bytes=limit)


# ----------------------------------------------------------------------------
# Pallas kernels
# ----------------------------------------------------------------------------

def _layernorm_kernel(x_ref, g_ref, b_ref, o_ref, *, eps):
    # x: (tm, E) fp32 ; gamma/beta: (1, E)
    x = x_ref[...]
    mu = jnp.mean(x, axis=-1, keepdims=True)
    xc = x - mu
    var = jnp.mean(xc * xc, axis=-1, keepdims=True)
    o_ref[...] = xc * lax.rsqrt(var + eps) * g_ref[...] + b_ref[...]


def _ln_qkv_kernel(x_ref, g_ref, b_ref, wq_ref, wk_ref, wv_ref,
                   bq_ref, bk_ref, bv_ref, oq_ref, ok_ref, ov_ref, *, eps):
    # Fused LayerNorm (computed once, fp32 stats) + three E->E projections.
    # Q scale (1/sqrt(dh)) is pre-folded into wq/bq at init. Outputs bf16.
    x = x_ref[...]
    mu = jnp.mean(x, axis=-1, keepdims=True)
    xc = x - mu
    var = jnp.mean(xc * xc, axis=-1, keepdims=True)
    h = (xc * lax.rsqrt(var + eps) * g_ref[...] + b_ref[...]).astype(wq_ref.dtype)
    oq_ref[...] = (jnp.dot(h, wq_ref[...], preferred_element_type=jnp.float32)
                   + bq_ref[...]).astype(oq_ref.dtype)
    ok_ref[...] = (jnp.dot(h, wk_ref[...], preferred_element_type=jnp.float32)
                   + bk_ref[...]).astype(ok_ref.dtype)
    ov_ref[...] = (jnp.dot(h, wv_ref[...], preferred_element_type=jnp.float32)
                   + bv_ref[...]).astype(ov_ref.dtype)


def _ln_linear_kernel(x_ref, g_ref, b_ref, w_ref, bias_ref, o_ref, *, eps, relu):
    # Fused LayerNorm (fp32 stats) + linear (+ optional ReLU). Output dtype of o_ref.
    x = x_ref[...]
    mu = jnp.mean(x, axis=-1, keepdims=True)
    xc = x - mu
    var = jnp.mean(xc * xc, axis=-1, keepdims=True)
    h = xc * lax.rsqrt(var + eps) * g_ref[...] + b_ref[...]
    y = jnp.dot(h.astype(w_ref.dtype), w_ref[...],
                preferred_element_type=jnp.float32) + bias_ref[...]
    if relu:
        y = jnp.maximum(y, 0.0)
    o_ref[...] = y.astype(o_ref.dtype)


def _linear_residual_kernel(x_ref, w_ref, b_ref, r_ref, o_ref):
    # Fused linear + bias + residual add (residual / output stay fp32, x may be bf16).
    o_ref[...] = (
        jnp.dot(x_ref[...].astype(w_ref.dtype), w_ref[...],
                preferred_element_type=jnp.float32)
        + b_ref[...]
        + r_ref[...]
    )


def _matmul_bias_kernel(x_ref, w_ref, b_ref, o_ref):
    # K-tiled matmul; accumulates directly into the VMEM-resident output block
    # (out block index is invariant over the last, "arbitrary", grid axis).
    @pl.when(pl.program_id(2) == 0)
    def _():
        o_ref[...] = jnp.broadcast_to(b_ref[...], o_ref.shape).astype(o_ref.dtype)

    acc = o_ref[...].astype(jnp.float32) + jnp.dot(
        x_ref[...].astype(w_ref.dtype), w_ref[...],
        preferred_element_type=jnp.float32)
    o_ref[...] = acc.astype(o_ref.dtype)


def _self_attn_kernel(q_ref, k_ref, v_ref, o_ref):
    # Causal multi-head self attention, all heads batched in one einsum pair.
    # q/k/v: (H, T, dh) bf16 (Q pre-scaled at init), o: (H, T, dh) bf16.
    q = q_ref[...]
    k = k_ref[...]
    v = v_ref[...]
    t = q.shape[1]
    s = jnp.einsum('hqd,hkd->hqk', q, k, preferred_element_type=jnp.float32)
    row = lax.broadcasted_iota(jnp.int32, (t, t), 0)
    col = lax.broadcasted_iota(jnp.int32, (t, t), 1)
    s = jnp.where(col > row, -jnp.inf, s)
    m = jnp.max(s, axis=-1, keepdims=True)
    p = jnp.exp(s - m)
    p = p * pl.reciprocal(jnp.sum(p, axis=-1, keepdims=True), approx=True)
    o_ref[...] = jnp.einsum('hqk,hkd->hqd', p.astype(v.dtype), v,
                            preferred_element_type=jnp.float32).astype(o_ref.dtype)


def _cross_attn_kernel(q_ref, k_ref, v_ref, bias_ref, o_ref):
    # Encoder (cross) attention with additive key-padding bias, all heads batched.
    # q: (H, T, dh), k/v: (H, Tk, dh) bf16, bias: (1, Tk) fp32 in {0, -inf}.
    q = q_ref[...]
    k = k_ref[...]
    v = v_ref[...]
    bias = bias_ref[...]
    s = jnp.einsum('hqd,hkd->hqk', q, k, preferred_element_type=jnp.float32)
    s = s + bias                                     # (1,Tk) broadcasts over (H,T,Tk)
    m = jnp.max(s, axis=-1, keepdims=True)
    m = jnp.where(jnp.isfinite(m), m, 0.0)           # fully-masked-row guard
    p = jnp.exp(s - m)
    denom = jnp.sum(p, axis=-1, keepdims=True)
    denom = jnp.where(denom == 0.0, 1.0, denom)
    p = p * pl.reciprocal(denom, approx=True)
    o_ref[...] = jnp.einsum('hqk,hkd->hqd', p.astype(v.dtype), v,
                            preferred_element_type=jnp.float32).astype(o_ref.dtype)


# ----------------------------------------------------------------------------
# Pallas wrappers
# ----------------------------------------------------------------------------

def pallas_layernorm(x2d, gamma, beta, eps=1e-5):
    n, e = x2d.shape
    tm = _row_tile(n)
    block_bytes = 2 * tm * e * 4 + 2 * e * 4
    return pl.pallas_call(
        functools.partial(_layernorm_kernel, eps=eps),
        out_shape=jax.ShapeDtypeStruct((n, e), jnp.float32),
        grid=(pl.cdiv(n, tm),),
        in_specs=[
            pl.BlockSpec((tm, e), lambda i: (i, 0)),
            pl.BlockSpec((1, e), lambda i: (0, 0)),
            pl.BlockSpec((1, e), lambda i: (0, 0)),
        ],
        out_specs=pl.BlockSpec((tm, e), lambda i: (i, 0)),
        compiler_params=_cparams(("parallel",), block_bytes),
    )(x2d.astype(jnp.float32), gamma, beta)


def fused_ln_qkv(x2d, gamma, beta, wq, wk, wv, bq, bk, bv, *, eps=1e-5):
    """LayerNorm(x) once, then three E->E projections; outputs bf16 Q/K/V."""
    n, e = x2d.shape
    tm = _row_tile(n)
    block_bytes = tm * e * 4 + 3 * e * e * 2 + 3 * tm * e * 2 + 8 * e * 4
    row_spec = pl.BlockSpec((tm, e), lambda i: (i, 0))
    vec_spec = pl.BlockSpec((1, e), lambda i: (0, 0))
    w_spec = pl.BlockSpec((e, e), lambda i: (0, 0))
    out_spec = pl.BlockSpec((tm, e), lambda i: (i, 0))
    return pl.pallas_call(
        functools.partial(_ln_qkv_kernel, eps=eps),
        out_shape=(jax.ShapeDtypeStruct((n, e), MATMUL_DTYPE),
                   jax.ShapeDtypeStruct((n, e), MATMUL_DTYPE),
                   jax.ShapeDtypeStruct((n, e), MATMUL_DTYPE)),
        grid=(pl.cdiv(n, tm),),
        in_specs=[row_spec, vec_spec, vec_spec,
                  w_spec, w_spec, w_spec,
                  vec_spec, vec_spec, vec_spec],
        out_specs=(out_spec, out_spec, out_spec),
        compiler_params=_cparams(("parallel",), block_bytes),
    )(x2d, gamma, beta, wq, wk, wv, bq, bk, bv)


def fused_ln_linear(x2d, gamma, beta, w_t, bias, *, relu=False, eps=1e-5,
                    out_dtype=jnp.float32):
    """LayerNorm(x) @ w_t + bias (optionally ReLU). x:(N,E) fp32, w_t:(E,F) bf16."""
    n, k = x2d.shape
    f = w_t.shape[1]
    tm = _row_tile(n)
    tf = _col_tile(f)
    block_bytes = tm * k * 4 + 2 * k * 4 + k * tf * 2 + tf * 4 + tm * tf * 4
    return pl.pallas_call(
        functools.partial(_ln_linear_kernel, eps=eps, relu=relu),
        out_shape=jax.ShapeDtypeStruct((n, f), out_dtype),
        grid=(pl.cdiv(n, tm), pl.cdiv(f, tf)),
        in_specs=[
            pl.BlockSpec((tm, k), lambda i, j: (i, 0)),
            pl.BlockSpec((1, k), lambda i, j: (0, 0)),
            pl.BlockSpec((1, k), lambda i, j: (0, 0)),
            pl.BlockSpec((k, tf), lambda i, j: (0, j)),
            pl.BlockSpec((1, tf), lambda i, j: (0, j)),
        ],
        out_specs=pl.BlockSpec((tm, tf), lambda i, j: (i, j)),
        compiler_params=_cparams(("parallel", "parallel"), block_bytes),
    )(x2d, gamma, beta, w_t, bias)


def fused_linear_residual(x2d, w_t, bias, residual2d):
    """x @ w_t + bias + residual.  x:(N,E) bf16/fp32, w_t:(E,F) bf16, residual:(N,F) fp32."""
    n, k = x2d.shape
    f = w_t.shape[1]
    tm = _row_tile(n)
    tf = _col_tile(f)
    block_bytes = tm * k * 4 + k * tf * 2 + tf * 4 + 2 * tm * tf * 4
    return pl.pallas_call(
        _linear_residual_kernel,
        out_shape=jax.ShapeDtypeStruct((n, f), jnp.float32),
        grid=(pl.cdiv(n, tm), pl.cdiv(f, tf)),
        in_specs=[
            pl.BlockSpec((tm, k), lambda i, j: (i, 0)),
            pl.BlockSpec((k, tf), lambda i, j: (0, j)),
            pl.BlockSpec((1, tf), lambda i, j: (0, j)),
            pl.BlockSpec((tm, tf), lambda i, j: (i, j)),
        ],
        out_specs=pl.BlockSpec((tm, tf), lambda i, j: (i, j)),
        compiler_params=_cparams(("parallel", "parallel"), block_bytes),
    )(x2d, w_t, bias, residual2d)


def pallas_linear(x2d, w_t, bias, *, out_dtype=jnp.float32):
    """Tiled/pipelined x @ w_t + bias; fp32 accumulation into the resident out block.

    Non-fp32 outputs force a single K step (no multi-step accumulation in bf16).
    """
    n, k = x2d.shape
    f = w_t.shape[1]
    tm = _row_tile(n)
    tf = _col_tile(f)
    tk = k if out_dtype != jnp.float32 else _k_tile(k)
    block_bytes = tm * tk * 4 + tk * tf * 2 + tf * 4 + 2 * tm * tf * 4
    return pl.pallas_call(
        _matmul_bias_kernel,
        out_shape=jax.ShapeDtypeStruct((n, f), out_dtype),
        grid=(pl.cdiv(n, tm), pl.cdiv(f, tf), k // tk),
        in_specs=[
            pl.BlockSpec((tm, tk), lambda i, j, kk: (i, kk)),
            pl.BlockSpec((tk, tf), lambda i, j, kk: (kk, j)),
            pl.BlockSpec((1, tf), lambda i, j, kk: (0, j)),
        ],
        out_specs=pl.BlockSpec((tm, tf), lambda i, j, kk: (i, j)),
        compiler_params=_cparams(("parallel", "parallel", "arbitrary"), block_bytes),
    )(x2d, w_t, bias)


def pallas_self_attention(q, k, v):
    """q/k/v: (B, H, T, dh) bf16, causal; returns (B, H, T, dh) bf16."""
    b, h, t, dh = q.shape
    # operands + output (x2 for double buffering) + fp32 scores/exp temps + bf16 P
    block_bytes = (4 * h * t * dh * 2) * 2 + 2 * h * t * t * 4 + h * t * t * 2
    spec = pl.BlockSpec((None, h, t, dh), lambda bi: (bi, 0, 0, 0))
    return pl.pallas_call(
        _self_attn_kernel,
        out_shape=jax.ShapeDtypeStruct((b, h, t, dh), q.dtype),
        grid=(b,),
        in_specs=[spec, spec, spec],
        out_specs=spec,
        compiler_params=_cparams(("parallel",), block_bytes),
    )(q, k, v)


def pallas_cross_attention(q, k, v, bias):
    """q:(B,H,T,dh), k/v:(B,H,Tk,dh) bf16, bias:(B,1,Tk) additive fp32 -> (B,H,T,dh)."""
    b, h, t, dh = q.shape
    tkv = k.shape[2]
    block_bytes = ((h * t * dh + 2 * h * tkv * dh + h * t * dh) * 2 + tkv * 4) * 2 \
        + 2 * h * t * tkv * 4 + h * t * tkv * 2
    q_spec = pl.BlockSpec((None, h, t, dh), lambda bi: (bi, 0, 0, 0))
    kv_spec = pl.BlockSpec((None, h, tkv, dh), lambda bi: (bi, 0, 0, 0))
    return pl.pallas_call(
        _cross_attn_kernel,
        out_shape=jax.ShapeDtypeStruct((b, h, t, dh), q.dtype),
        grid=(b,),
        in_specs=[
            q_spec,
            kv_spec,
            kv_spec,
            pl.BlockSpec((None, 1, tkv), lambda bi: (bi, 0, 0)),
        ],
        out_specs=q_spec,
        compiler_params=_cparams(("parallel",), block_bytes),
    )(q, k, v, bias)


# ----------------------------------------------------------------------------
# Head-major layout plumbing (XLA side; cheap relative to kernel work)
# ----------------------------------------------------------------------------

def _to_heads(x2d, b, t, nheads):
    e = x2d.shape[-1]
    return jnp.transpose(x2d.reshape(b, t, nheads, e // nheads), (0, 2, 1, 3))


def _from_heads(xh, b, t):
    bb, h, tt, dh = xh.shape
    return jnp.transpose(xh, (0, 2, 1, 3)).reshape(b * t, h * dh)


# ----------------------------------------------------------------------------
# Parameter init (weights pre-transposed / pre-split, matmul operands in bf16,
#                 1/sqrt(dh) folded into the Q projections)
# ----------------------------------------------------------------------------

def _xavier_uniform(key, shape):
    fan_out, fan_in = shape  # torch Linear weight convention (out, in)
    bound = math.sqrt(6.0 / (fan_in + fan_out))
    return jax.random.uniform(key, shape, jnp.float32, -bound, bound)


def init_params(key, embed_size, vocab_size, num_layers, nheads, max_pos=1024):
    e, v = embed_size, vocab_size
    assert e % nheads == 0
    scale = (e // nheads) ** -0.5
    keys = iter(jax.random.split(key, 3 + num_layers * 6))
    p = {}
    # token embedding: normal(0, E^-0.5), padding row (vocab-1) zeroed
    tok = jax.random.normal(next(keys), (v, e), jnp.float32) * (e ** -0.5)
    p["tok_emb"] = tok.at[v - 1].set(0.0)
    # learned positional embedding (1024, E), padding_idx=0 zeroed
    pos = jax.random.normal(next(keys), (max_pos, e), jnp.float32) * (e ** -0.5)
    p["pos_emb"] = pos.at[0].set(0.0)
    # decoder-level feature layer norm
    p["ln_feat_g"] = jnp.ones((1, e), jnp.float32)
    p["ln_feat_b"] = jnp.zeros((1, e), jnp.float32)
    # output projection (vocab-1, E), stored transposed
    out_w = _xavier_uniform(next(keys), (v - 1, e))
    p["out_wt"] = out_w.T.astype(MATMUL_DTYPE)
    p["out_b"] = jnp.zeros((1, v - 1), jnp.float32)

    layers = []
    kv_blocks = []
    kv_bias_blocks = []
    for _ in range(num_layers):
        lp = {}
        # --- self attention in-proj, split into Q/K/V; Q scaled by 1/sqrt(dh) ---
        self_in_w = _xavier_uniform(next(keys), (3 * e, e))
        lp["self_q_wt"] = (self_in_w[:e].T * scale).astype(MATMUL_DTYPE)
        lp["self_k_wt"] = self_in_w[e:2 * e].T.astype(MATMUL_DTYPE)
        lp["self_v_wt"] = self_in_w[2 * e:].T.astype(MATMUL_DTYPE)
        lp["self_q_b"] = jnp.zeros((1, e), jnp.float32) * scale
        lp["self_k_b"] = jnp.zeros((1, e), jnp.float32)
        lp["self_v_b"] = jnp.zeros((1, e), jnp.float32)
        self_out_w = _xavier_uniform(next(keys), (e, e))
        lp["self_out_wt"] = self_out_w.T.astype(MATMUL_DTYPE)
        lp["self_out_b"] = jnp.zeros((1, e), jnp.float32)
        # --- encoder attention: Q per layer (scaled); K/V gathered for hoisting ---
        enc_in_w = _xavier_uniform(next(keys), (3 * e, e))
        lp["enc_q_wt"] = (enc_in_w[:e].T * scale).astype(MATMUL_DTYPE)
        lp["enc_q_b"] = jnp.zeros((1, e), jnp.float32) * scale
        kv_blocks.append(jnp.concatenate([enc_in_w[e:2 * e].T, enc_in_w[2 * e:].T],
                                         axis=1))                      # (E, 2E)
        kv_bias_blocks.append(jnp.zeros((1, 2 * e), jnp.float32))
        enc_out_w = _xavier_uniform(next(keys), (e, e))
        lp["enc_out_wt"] = enc_out_w.T.astype(MATMUL_DTYPE)
        lp["enc_out_b"] = jnp.zeros((1, e), jnp.float32)
        # --- FFN ---
        fc1_w = _xavier_uniform(next(keys), (e, e))
        lp["fc1_wt"] = fc1_w.T.astype(MATMUL_DTYPE)
        lp["fc1_b"] = jnp.zeros((1, e), jnp.float32)
        fc2_w = _xavier_uniform(next(keys), (e, e))
        lp["fc2_wt"] = fc2_w.T.astype(MATMUL_DTYPE)
        lp["fc2_b"] = jnp.zeros((1, e), jnp.float32)
        for i in range(3):
            lp[f"ln{i}_g"] = jnp.ones((1, e), jnp.float32)
            lp[f"ln{i}_b"] = jnp.zeros((1, e), jnp.float32)
        layers.append(lp)
    p["layers"] = layers
    # Hoisted encoder-K/V projection for ALL layers: columns [l0_K|l0_V|l1_K|l1_V|...]
    p["enc_kv_all_wt"] = jnp.concatenate(kv_blocks, axis=1).astype(MATMUL_DTYPE)
    p["enc_kv_all_b"] = jnp.concatenate(kv_bias_blocks, axis=1)
    return p


# ----------------------------------------------------------------------------
# Forward pass (mirrors DecoderTransformer.forward with incremental_state=None)
# ----------------------------------------------------------------------------

def decoder_transformer_forward(params, features, mask, captions, *, embed_size, nheads):
    e = embed_size
    dh = e // nheads
    embed_scale = math.sqrt(e)
    num_layers = len(params["layers"])

    b, _, t_enc = features.shape
    t = captions.shape[1]

    # features (B, E, T_enc) -> (B, T_enc, E), then feature LayerNorm.
    # (Reference uses (T_enc, B, E); LN/linear/attention are row- and batch-local,
    #  so the batch-major layout is equivalent and avoids all relayouts.)
    feats = jnp.transpose(features, (0, 2, 1)).astype(jnp.float32)
    feats2d = pallas_layernorm(feats.reshape(b * t_enc, e),
                               params["ln_feat_g"], params["ln_feat_b"])

    # key padding mask: (1 - mask.squeeze(1)) nonzero where padded -> additive -inf bias
    key_pad = 1.0 - mask[:, 0, :].astype(jnp.float32)
    enc_bias = jnp.where(key_pad > 0.5, -jnp.inf, 0.0).astype(jnp.float32)
    enc_bias = enc_bias.reshape(b, 1, t_enc)

    # Hoisted encoder-K/V projection for all layers (features streamed once).
    kv_all = pallas_linear(feats2d.astype(MATMUL_DTYPE),
                           params["enc_kv_all_wt"], params["enc_kv_all_b"],
                           out_dtype=MATMUL_DTYPE)            # (B*T_enc, 2*E*L) bf16
    kv_heads = jnp.transpose(
        kv_all.reshape(b, t_enc, num_layers, 2, nheads, dh),
        (2, 3, 0, 4, 1, 5))                                   # (L, 2, B, H, T_enc, dh)

    # learned positional embedding (fairseq make_positions, padding_idx=0, left_pad=False):
    # non-pad token at column c gets position 1 + c, positions at pad (token==0) get 0.
    pos_ids = jnp.where(captions != 0,
                        1 + jnp.arange(t, dtype=captions.dtype)[None, :], 0)
    # TODO(synk): embedding gathers stay as XLA ops (no clean small-Pallas equivalent).
    x = embed_scale * params["tok_emb"][captions] + params["pos_emb"][pos_ids]  # (B,T,E)
    x2d = x.reshape(b * t, e).astype(jnp.float32)   # rows in (batch, time) order

    for li, lp in enumerate(params["layers"]):
        # --- self attention (pre-norm, causal): fused LN+QKV, head-batched attention ---
        q_s, k_s, v_s = fused_ln_qkv(x2d, lp["ln0_g"], lp["ln0_b"],
                                     lp["self_q_wt"], lp["self_k_wt"], lp["self_v_wt"],
                                     lp["self_q_b"], lp["self_k_b"], lp["self_v_b"])
        a = pallas_self_attention(_to_heads(q_s, b, t, nheads),
                                  _to_heads(k_s, b, t, nheads),
                                  _to_heads(v_s, b, t, nheads))       # (B,H,T,dh) bf16
        x2d = fused_linear_residual(_from_heads(a, b, t),
                                    lp["self_out_wt"], lp["self_out_b"], x2d)

        # --- encoder attention (key padding mask), K/V pre-projected outside loop ---
        q = fused_ln_linear(x2d, lp["ln1_g"], lp["ln1_b"],
                            lp["enc_q_wt"], lp["enc_q_b"],
                            out_dtype=MATMUL_DTYPE)                    # (B*T, E) bf16
        a = pallas_cross_attention(_to_heads(q, b, t, nheads),
                                   kv_heads[li, 0], kv_heads[li, 1], enc_bias)
        x2d = fused_linear_residual(_from_heads(a, b, t),
                                    lp["enc_out_wt"], lp["enc_out_b"], x2d)

        # --- feed forward: fused LN+fc1+ReLU (bf16 out), fused fc2+residual ---
        h = fused_ln_linear(x2d, lp["ln2_g"], lp["ln2_b"],
                            lp["fc1_wt"], lp["fc1_b"], relu=True,
                            out_dtype=MATMUL_DTYPE)
        x2d = fused_linear_residual(h, lp["fc2_wt"], lp["fc2_b"], x2d)

    # final vocab projection (tiled/pipelined, bf16 activations in) + argmax
    logits = pallas_linear(x2d.astype(MATMUL_DTYPE),
                           params["out_wt"], params["out_b"]).reshape(b, t, -1)
    predicted = jnp.argmax(logits, axis=-1)
    return logits, predicted


# ----------------------------------------------------------------------------
# Main
# ----------------------------------------------------------------------------

if __name__ == "__main__":
    B = 2
    EMBED = 64
    VOCAB = 32           # token padding_idx = VOCAB - 1
    NHEADS = 4
    T = 8                # caption length
    T_ENC = 8            # encoder (feature) length
    NUM_LAYERS = 2

    key = jax.random.PRNGKey(0)
    k_params, k_feat, k_cap = jax.random.split(key, 3)

    params = init_params(k_params, EMBED, VOCAB, NUM_LAYERS, NHEADS)

    # features come in as (B, embed_size, T_enc), like the PyTorch module expects
    features = jax.random.normal(k_feat, (B, EMBED, T_ENC), jnp.float32)
    # mask: (B, 1, T_enc), 1 = valid, 0 = padded (forward does mask = 1 - mask.squeeze(1))
    mask = jnp.ones((B, 1, T_ENC), jnp.float32)
    mask = mask.at[1, 0, T_ENC - 2:].set(0.0)
    # captions: avoid token pad (VOCAB-1) and positional pad symbol 0
    captions = jax.random.randint(k_cap, (B, T), 1, VOCAB - 1)

    fwd = jax.jit(functools.partial(decoder_transformer_forward,
                                    embed_size=EMBED, nheads=NHEADS))
    logits, predicted = fwd(params, features, mask, captions)
    jax.block_until_ready((logits, predicted))

    assert logits.shape == (B, T, VOCAB - 1)
    assert predicted.shape == (B, T)
    assert bool(jnp.all(jnp.isfinite(logits)))
    # TODO(synk): incremental_state (single-step sampling) path not implemented.
    # TODO(synk): flash-style KV tiling for long sequences (needed to stay within
    #             v7x's 64 MiB VMEM as T grows).
    print("KERNEL_OK")
</pallas_src>

<mosaic_0001>
module attributes {stable_mosaic.version = 11 : i64} {
  func.func @_ln_qkv_kernel(%arg0: i32, %arg1: memref<16x64xf32, #tpu.memory_space<vmem>>, %arg2: memref<1x64xf32, #tpu.memory_space<vmem>>, %arg3: memref<1x64xf32, #tpu.memory_space<vmem>>, %arg4: memref<64x64xbf16, #tpu.memory_space<vmem>>, %arg5: memref<64x64xbf16, #tpu.memory_space<vmem>>, %arg6: memref<64x64xbf16, #tpu.memory_space<vmem>>, %arg7: memref<1x64xf32, #tpu.memory_space<vmem>>, %arg8: memref<1x64xf32, #tpu.memory_space<vmem>>, %arg9: memref<1x64xf32, #tpu.memory_space<vmem>>, %arg10: memref<16x64xbf16, #tpu.memory_space<vmem>>, %arg11: memref<16x64xbf16, #tpu.memory_space<vmem>>, %arg12: memref<16x64xbf16, #tpu.memory_space<vmem>>) attributes {dimension_semantics = [#tpu.dimension_semantics<parallel>], iteration_bounds = array<i64: 1>, scalar_prefetch = 0 : i64, scratch_operands = 0 : i64, tpu.core_type = #tpu.core_type<tc>, window_params = [{transform_indices = @transform_0, window_bounds = array<i64: 16, 64>}, {pipeline_mode = #tpu.pipeline_mode<synchronous>, transform_indices = @transform_1, window_bounds = array<i64: 1, 64>}, {pipeline_mode = #tpu.pipeline_mode<synchronous>, transform_indices = @transform_2, window_bounds = array<i64: 1, 64>}, {pipeline_mode = #tpu.pipeline_mode<synchronous>, transform_indices = @transform_3, window_bounds = array<i64: 64, 64>}, {pipeline_mode = #tpu.pipeline_mode<synchronous>, transform_indices = @transform_4, window_bounds = array<i64: 64, 64>}, {pipeline_mode = #tpu.pipeline_mode<synchronous>, transform_indices = @transform_5, window_bounds = array<i64: 64, 64>}, {pipeline_mode = #tpu.pipeline_mode<synchronous>, transform_indices = @transform_6, window_bounds = array<i64: 1, 64>}, {pipeline_mode = #tpu.pipeline_mode<synchronous>, transform_indices = @transform_7, window_bounds = array<i64: 1, 64>}, {pipeline_mode = #tpu.pipeline_mode<synchronous>, transform_indices = @transform_8, window_bounds = array<i64: 1, 64>}, {transform_indices = @transform_9, window_bounds = array<i64: 16, 64>}, {transform_indices = @transform_10, window_bounds = array<i64: 16, 64>}, {transform_indices = @transform_11, window_bounds = array<i64: 16, 64>}]} {
    %c0 = arith.constant 0 : index
    %c0_0 = arith.constant 0 : index
    %0 = vector.load %arg1[%c0, %c0_0] : memref<16x64xf32, #tpu.memory_space<vmem>>, vector<16x64xf32>
    %cst = arith.constant dense<0.000000e+00> : vector<16xf32>
    %1 = vector.multi_reduction <add>, %0, %cst [1] : vector<16x64xf32> to vector<16xf32>
    %2 = vector.shape_cast %1 : vector<16xf32> to vector<16x1xf32>
    %cst_1 = arith.constant 6.400000e+01 : f32
    %3 = vector.broadcast %cst_1 : f32 to vector<16x1xf32>
    %4 = arith.divf %2, %3 : vector<16x1xf32>
    %5 = vector.broadcast %4 : vector<16x1xf32> to vector<16x64xf32>
    %6 = arith.subf %0, %5 : vector<16x64xf32>
    %7 = arith.mulf %6, %6 : vector<16x64xf32>
    %cst_2 = arith.constant dense<0.000000e+00> : vector<16xf32>
    %8 = vector.multi_reduction <add>, %7, %cst_2 [1] : vector<16x64xf32> to vector<16xf32>
    %9 = vector.shape_cast %8 : vector<16xf32> to vector<16x1xf32>
    %cst_3 = arith.constant 6.400000e+01 : f32
    %10 = vector.broadcast %cst_3 : f32 to vector<16x1xf32>
    %11 = arith.divf %9, %10 : vector<16x1xf32>
    %cst_4 = arith.constant 9.99999974E-6 : f32
    %12 = vector.broadcast %cst_4 : f32 to vector<16x1xf32>
    %13 = arith.addf %11, %12 : vector<16x1xf32>
    %14 = math.rsqrt %13 : vector<16x1xf32>
    %15 = vector.broadcast %14 : vector<16x1xf32> to vector<16x64xf32>
    %16 = arith.mulf %6, %15 : vector<16x64xf32>
    %c0_5 = arith.constant 0 : index
    %c0_6 = arith.constant 0 : index
    %17 = vector.load %arg2[%c0_5, %c0_6] : memref<1x64xf32, #tpu.memory_space<vmem>>, vector<1x64xf32>
    %18 = vector.broadcast %17 : vector<1x64xf32> to vector<16x64xf32>
    %19 = arith.mulf %16, %18 : vector<16x64xf32>
    %c0_7 = arith.constant 0 : index
    %c0_8 = arith.constant 0 : index
    %20 = vector.load %arg3[%c0_7, %c0_8] : memref<1x64xf32, #tpu.memory_space<vmem>>, vector<1x64xf32>
    %21 = vector.broadcast %20 : vector<1x64xf32> to vector<16x64xf32>
    %22 = arith.addf %19, %21 : vector<16x64xf32>
    %23 = arith.truncf %22 : vector<16x64xf32> to vector<16x64xbf16>
    %c0_9 = arith.constant 0 : index
    %c0_10 = arith.constant 0 : index
    %24 = vector.load %arg4[%c0_9, %c0_10] : memref<64x64xbf16, #tpu.memory_space<vmem>>, vector<64x64xbf16>
    %cst_11 = arith.constant dense<0.000000e+00> : vector<16x64xf32>
    %25 = tpu.matmul %23, %24, %cst_11 {dimension_numbers = #tpu.dot_dimension_numbers<[1], [0], [0], [1], [0, 0, 1, 1], [], []>} : vector<16x64xbf16>, vector<64x64xbf16>, vector<16x64xf32> -> vector<16x64xf32>
    %c0_12 = arith.constant 0 : index
    %c0_13 = arith.constant 0 : index
    %26 = vector.load %arg7[%c0_12, %c0_13] : memref<1x64xf32, #tpu.memory_space<vmem>>, vector<1x64xf32>
    %27 = vector.broadcast %26 : vector<1x64xf32> to vector<16x64xf32>
    %28 = arith.addf %25, %27 : vector<16x64xf32>
    %29 = arith.truncf %28 : vector<16x64xf32> to vector<16x64xbf16>
    %c0_14 = arith.constant 0 : index
    %c0_15 = arith.constant 0 : index
    %30 = vector.load %arg10[%c0_14, %c0_15] : memref<16x64xbf16, #tpu.memory_space<vmem>>, vector<16x64xbf16>
    tpu.vector_store %arg10[%c0_14, %c0_15], %29 {strides = array<i32>} : memref<16x64xbf16, #tpu.memory_space<vmem>>, vector<16x64xbf16>,
    %c0_16 = arith.constant 0 : index
    %c0_17 = arith.constant 0 : index
    %31 = vector.load %arg5[%c0_16, %c0_17] : memref<64x64xbf16, #tpu.memory_space<vmem>>, vector<64x64xbf16>
    %cst_18 = arith.constant dense<0.000000e+00> : vector<16x64xf32>
    %32 = tpu.matmul %23, %31, %cst_18 {dimension_numbers = #tpu.dot_dimension_numbers<[1], [0], [0], [1], [0, 0, 1, 1], [], []>} : vector<16x64xbf16>, vector<64x64xbf16>, vector<16x64xf32> -> vector<16x64xf32>
    %c0_19 = arith.constant 0 : index
    %c0_20 = arith.constant 0 : index
    %33 = vector.load %arg8[%c0_19, %c0_20] : memref<1x64xf32, #tpu.memory_space<vmem>>, vector<1x64xf32>
    %34 = vector.broadcast %33 : vector<1x64xf32> to vector<16x64xf32>
    %35 = arith.addf %32, %34 : vector<16x64xf32>
    %36 = arith.truncf %35 : vector<16x64xf32> to vector<16x64xbf16>
    %c0_21 = arith.constant 0 : index
    %c0_22 = arith.constant 0 : index
    %37 = vector.load %arg11[%c0_21, %c0_22] : memref<16x64xbf16, #tpu.memory_space<vmem>>, vector<16x64xbf16>
    tpu.vector_store %arg11[%c0_21, %c0_22], %36 {strides = array<i32>} : memref<16x64xbf16, #tpu.memory_space<vmem>>, vector<16x64xbf16>,
    %c0_23 = arith.constant 0 : index
    %c0_24 = arith.constant 0 : index
    %38 = vector.load %arg6[%c0_23, %c0_24] : memref<64x64xbf16, #tpu.memory_space<vmem>>, vector<64x64xbf16>
    %cst_25 = arith.constant dense<0.000000e+00> : vector<16x64xf32>
    %39 = tpu.matmul %23, %38, %cst_25 {dimension_numbers = #tpu.dot_dimension_numbers<[1], [0], [0], [1], [0, 0, 1, 1], [], []>} : vector<16x64xbf16>, vector<64x64xbf16>, vector<16x64xf32> -> vector<16x64xf32>
    %c0_26 = arith.constant 0 : index
    %c0_27 = arith.constant 0 : index
    %40 = vector.load %arg9[%c0_26, %c0_27] : memref<1x64xf32, #tpu.memory_space<vmem>>, vector<1x64xf32>
    %41 = vector.broadcast %40 : vector<1x64xf32> to vector<16x64xf32>
    %42 = arith.addf %39, %41 : vector<16x64xf32>
    %43 = arith.truncf %42 : vector<16x64xf32> to vector<16x64xbf16>
    %c0_28 = arith.constant 0 : index
    %c0_29 = arith.constant 0 : index
    %44 = vector.load %arg12[%c0_28, %c0_29] : memref<16x64xbf16, #tpu.memory_space<vmem>>, vector<16x64xbf16>
    tpu.vector_store %arg12[%c0_28, %c0_29], %43 {strides = array<i32>} : memref<16x64xbf16, #tpu.memory_space<vmem>>, vector<16x64xbf16>,
    return
  }
  func.func @transform_0(%arg0: i32) -> (i32, i32) {
    %c0_i32 = arith.constant 0 : i32
    %c0_i32_0 = arith.constant 0 : i32
    return %arg0, %c0_i32 : i32, i32
  }
  func.func @transform_1(%arg0: i32) -> (i32, i32) {
    %c0_i32 = arith.constant 0 : i32
    %c0_i32_0 = arith.constant 0 : i32
    %c0_i32_1 = arith.constant 0 : i32
    return %c0_i32, %c0_i32_0 : i32, i32
  }
  func.func @transform_2(%arg0: i32) -> (i32, i32) {
    %c0_i32 = arith.constant 0 : i32
    %c0_i32_0 = arith.constant 0 : i32
    %c0_i32_1 = arith.constant 0 : i32
    return %c0_i32, %c0_i32_0 : i32, i32
  }
  func.func @transform_3(%arg0: i32) -> (i32, i32) {
    %c0_i32 = arith.constant 0 : i32
    %c0_i32_0 = arith.constant 0 : i32
    %c0_i32_1 = arith.constant 0 : i32
    return %c0_i32, %c0_i32_0 : i32, i32
  }
  func.func @transform_4(%arg0: i32) -> (i32, i32) {
    %c0_i32 = arith.constant 0 : i32
    %c0_i32_0 = arith.constant 0 : i32
    %c0_i32_1 = arith.constant 0 : i32
    return %c0_i32, %c0_i32_0 : i32, i32
  }
  func.func @transform_5(%arg0: i32) -> (i32, i32) {
    %c0_i32 = arith.constant 0 : i32
    %c0_i32_0 = arith.constant 0 : i32
    %c0_i32_1 = arith.constant 0 : i32
    return %c0_i32, %c0_i32_0 : i32, i32
  }
  func.func @transform_6(%arg0: i32) -> (i32, i32) {
    %c0_i32 = arith.constant 0 : i32
    %c0_i32_0 = arith.constant 0 : i32
    %c0_i32_1 = arith.constant 0 : i32
    return %c0_i32, %c0_i32_0 : i32, i32
  }
  func.func @transform_7(%arg0: i32) -> (i32, i32) {
    %c0_i32 = arith.constant 0 : i32
    %c0_i32_0 = arith.constant 0 : i32
    %c0_i32_1 = arith.constant 0 : i32
    return %c0_i32, %c0_i32_0 : i32, i32
  }
  func.func @transform_8(%arg0: i32) -> (i32, i32) {
    %c0_i32 = arith.constant 0 : i32
    %c0_i32_0 = arith.constant 0 : i32
    %c0_i32_1 = arith.constant 0 : i32
    return %c0_i32, %c0_i32_0 : i32, i32
  }
  func.func @transform_9(%arg0: i32) -> (i32, i32) {
    %c0_i32 = arith.constant 0 : i32
    %c0_i32_0 = arith.constant 0 : i32
    return %arg0, %c0_i32 : i32, i32
  }
  func.func @transform_10(%arg0: i32) -> (i32, i32) {
    %c0_i32 = arith.constant 0 : i32
    %c0_i32_0 = arith.constant 0 : i32
    return %arg0, %c0_i32 : i32, i32
  }
  func.func @transform_11(%arg0: i32) -> (i32, i32) {
    %c0_i32 = arith.constant 0 : i32
    %c0_i32_0 = arith.constant 0 : i32
    return %arg0, %c0_i32 : i32, i32
  }
}

module attributes {stable_mosaic.version = 11 : i64} {
  func.func @_self_attn_kernel(%arg0: i32, %arg1: memref<1x4x8x16xbf16, #tpu.memory_space<vmem>>, %arg2: memref<1x4x8x16xbf16, #tpu.memory_space<vmem>>, %arg3: memref<1x4x8x16xbf16, #tpu.memory_space<vmem>>, %arg4: memref<1x4x8x16xbf16, #tpu.memory_space<vmem>>) attributes {dimension_semantics = [#tpu.dimension_semantics<parallel>], iteration_bounds = array<i64: 2>, scalar_prefetch = 0 : i64, scratch_operands = 0 : i64, tpu.core_type = #tpu.core_type<tc>, window_params = [{transform_indices = @transform_0, window_bounds = array<i64: 1, 4, 8, 16>}, {transform_indices = @transform_1, window_bounds = array<i64: 1, 4, 8, 16>}, {transform_indices = @transform_2, window_bounds = array<i64: 1, 4, 8, 16>}, {transform_indices = @transform_3, window_bounds = array<i64: 1, 4, 8, 16>}]} {
    %c0 = arith.constant 0 : index
    %c0_0 = arith.constant 0 : index
    %c0_1 = arith.constant 0 : index
    %c0_2 = arith.constant 0 : index
    %0 = vector.load %arg1[%c0, %c0_0, %c0_1, %c0_2] : memref<1x4x8x16xbf16, #tpu.memory_space<vmem>>, vector<1x4x8x16xbf16>
    %1 = vector.shape_cast %0 : vector<1x4x8x16xbf16> to vector<4x8x16xbf16>
    %c0_3 = arith.constant 0 : index
    %c0_4 = arith.constant 0 : index
    %c0_5 = arith.constant 0 : index
    %c0_6 = arith.constant 0 : index
    %2 = vector.load %arg2[%c0_3, %c0_4, %c0_5, %c0_6] : memref<1x4x8x16xbf16, #tpu.memory_space<vmem>>, vector<1x4x8x16xbf16>
    %3 = vector.shape_cast %2 : vector<1x4x8x16xbf16> to vector<4x8x16xbf16>
    %c0_7 = arith.constant 0 : index
    %c0_8 = arith.constant 0 : index
    %c0_9 = arith.constant 0 : index
    %c0_10 = arith.constant 0 : index
    %4 = vector.load %arg3[%c0_7, %c0_8, %c0_9, %c0_10] : memref<1x4x8x16xbf16, #tpu.memory_space<vmem>>, vector<1x4x8x16xbf16>
    %5 = vector.shape_cast %4 : vector<1x4x8x16xbf16> to vector<4x8x16xbf16>
    "tpu.trace_start"() <{level = 10 : i32, message = "hqd,hkd->hqk"}> : () -> ()
    %cst = arith.constant dense<0.000000e+00> : vector<4x8x8xf32>
    %6 = tpu.matmul %1, %3, %cst {dimension_numbers = #tpu.dot_dimension_numbers<[2], [2], [1], [1], [0, 0, 0, 1, 1, 1], [0], [0]>} : vector<4x8x16xbf16>, vector<4x8x16xbf16>, vector<4x8x8xf32> -> vector<4x8x8xf32>
    "tpu.trace_stop"() : () -> ()
    %7 = tpu.iota {dimensions = array<i32: 0>} : vector<8x8xi32>
    %8 = tpu.iota {dimensions = array<i32: 1>} : vector<8x8xi32>
    %9 = arith.cmpi sgt, %8, %7 : vector<8x8xi32>
    %cst_11 = arith.constant 0xFF800000 : f32
    %10 = vector.shape_cast %9 : vector<8x8xi1> to vector<1x8x8xi1>
    %11 = vector.broadcast %10 : vector<1x8x8xi1> to vector<4x8x8xi1>
    %12 = vector.broadcast %cst_11 : f32 to vector<4x8x8xf32>
    %13 = arith.select %11, %12, %6 : vector<4x8x8xi1>, vector<4x8x8xf32>
    %cst_12 = arith.constant dense<0xFF800000> : vector<4x8xf32>
    %14 = vector.multi_reduction <maximumf>, %13, %cst_12 [2] : vector<4x8x8xf32> to vector<4x8xf32>
    %15 = vector.shape_cast %14 : vector<4x8xf32> to vector<4x8x1xf32>
    %16 = vector.broadcast %15 : vector<4x8x1xf32> to vector<4x8x8xf32>
    %17 = arith.subf %13, %16 : vector<4x8x8xf32>
    %18 = math.exp %17 : vector<4x8x8xf32>
    %cst_13 = arith.constant dense<0.000000e+00> : vector<4x8xf32>
    %19 = vector.multi_reduction <add>, %18, %cst_13 [2] : vector<4x8x8xf32> to vector<4x8xf32>
    %20 = vector.shape_cast %19 : vector<4x8xf32> to vector<4x8x1xf32>
    %21 = tpu.reciprocal %20 {approx = true} : vector<4x8x1xf32> -> vector<4x8x1xf32>
    %22 = vector.broadcast %21 : vector<4x8x1xf32> to vector<4x8x8xf32>
    %23 = arith.mulf %18, %22 : vector<4x8x8xf32>
    %24 = arith.truncf %23 : vector<4x8x8xf32> to vector<4x8x8xbf16>
    "tpu.trace_start"() <{level = 10 : i32, message = "hqk,hkd->hqd"}> : () -> ()
    %cst_14 = arith.constant dense<0.000000e+00> : vector<4x8x16xf32>
    %25 = tpu.matmul %24, %5, %cst_14 {dimension_numbers = #tpu.dot_dimension_numbers<[2], [1], [1], [2], [0, 0, 0, 1, 1, 2], [0], [0]>} : vector<4x8x8xbf16>, vector<4x8x16xbf16>, vector<4x8x16xf32> -> vector<4x8x16xf32>
    "tpu.trace_stop"() : () -> ()
    %26 = arith.truncf %25 : vector<4x8x16xf32> to vector<4x8x16xbf16>
    %c0_15 = arith.constant 0 : index
    %c0_16 = arith.constant 0 : index
    %c0_17 = arith.constant 0 : index
    %c0_18 = arith.constant 0 : index
    %27 = vector.load %arg4[%c0_15, %c0_16, %c0_17, %c0_18] : memref<1x4x8x16xbf16, #tpu.memory_space<vmem>>, vector<1x4x8x16xbf16>
    %28 = vector.shape_cast %27 : vector<1x4x8x16xbf16> to vector<4x8x16xbf16>
    %29 = vector.shape_cast %26 : vector<4x8x16xbf16> to vector<1x4x8x16xbf16>
    tpu.vector_store %arg4[%c0_15, %c0_16, %c0_17, %c0_18], %29 {strides = array<i32>} : memref<1x4x8x16xbf16, #tpu.memory_space<vmem>>, vector<1x4x8x16xbf16>,
    return
  }
  func.func @transform_0(%arg0: i32) -> (i32, i32, i32, i32) {
    %c0_i32 = arith.constant 0 : i32
    %c0_i32_0 = arith.constant 0 : i32
    %c0_i32_1 = arith.constant 0 : i32
    %c0_i32_2 = arith.constant 0 : i32
    return %arg0, %c0_i32, %c0_i32_0, %c0_i32_1 : i32, i32, i32, i32
  }
  func.func @transform_1(%arg0: i32) -> (i32, i32, i32, i32) {
    %c0_i32 = arith.constant 0 : i32
    %c0_i32_0 = arith.constant 0 : i32
    %c0_i32_1 = arith.constant 0 : i32
    %c0_i32_2 = arith.constant 0 : i32
    return %arg0, %c0_i32, %c0_i32_0, %c0_i32_1 : i32, i32, i32, i32
  }
  func.func @transform_2(%arg0: i32) -> (i32, i32, i32, i32) {
    %c0_i32 = arith.constant 0 : i32
    %c0_i32_0 = arith.constant 0 : i32
    %c0_i32_1 = arith.constant 0 : i32
    %c0_i32_2 = arith.constant 0 : i32
    return %arg0, %c0_i32, %c0_i32_0, %c0_i32_1 : i32, i32, i32, i32
  }
  func.func @transform_3(%arg0: i32) -> (i32, i32, i32, i32) {
    %c0_i32 = arith.constant 0 : i32
    %c0_i32_0 = arith.constant 0 : i32
    %c0_i32_1 = arith.constant 0 : i32
    %c0_i32_2 = arith.constant 0 : i32
    return %arg0, %c0_i32, %c0_i32_0, %c0_i32_1 : i32, i32, i32, i32
  }
}

module attributes {stable_mosaic.version = 11 : i64} {
  func.func @_linear_residual_kernel(%arg0: i32, %arg1: i32, %arg2: memref<16x64xbf16, #tpu.memory_space<vmem>>, %arg3: memref<64x64xbf16, #tpu.memory_space<vmem>>, %arg4: memref<1x64xf32, #tpu.memory_space<vmem>>, %arg5: memref<16x64xf32, #tpu.memory_space<vmem>>, %arg6: memref<16x64xf32, #tpu.memory_space<vmem>>) attributes {dimension_semantics = [#tpu.dimension_semantics<parallel>, #tpu.dimension_semantics<parallel>], iteration_bounds = array<i64: 1, 1>, scalar_prefetch = 0 : i64, scratch_operands = 0 : i64, tpu.core_type = #tpu.core_type<tc>, window_params = [{transform_indices = @transform_0, window_bounds = array<i64: 16, 64>}, {transform_indices = @transform_1, window_bounds = array<i64: 64, 64>}, {transform_indices = @transform_2, window_bounds = array<i64: 1, 64>}, {transform_indices = @transform_3, window_bounds = array<i64: 16, 64>}, {transform_indices = @transform_4, window_bounds = array<i64: 16, 64>}]} {
    %c0 = arith.constant 0 : index
    %c0_0 = arith.constant 0 : index
    %0 = vector.load %arg2[%c0, %c0_0] : memref<16x64xbf16, #tpu.memory_space<vmem>>, vector<16x64xbf16>
    %c0_1 = arith.constant 0 : index
    %c0_2 = arith.constant 0 : index
    %1 = vector.load %arg3[%c0_1, %c0_2] : memref<64x64xbf16, #tpu.memory_space<vmem>>, vector<64x64xbf16>
    %cst = arith.constant dense<0.000000e+00> : vector<16x64xf32>
    %2 = tpu.matmul %0, %1, %cst {dimension_numbers = #tpu.dot_dimension_numbers<[1], [0], [0], [1], [0, 0, 1, 1], [], []>} : vector<16x64xbf16>, vector<64x64xbf16>, vector<16x64xf32> -> vector<16x64xf32>
    %c0_3 = arith.constant 0 : index
    %c0_4 = arith.constant 0 : index
    %3 = vector.load %arg4[%c0_3, %c0_4] : memref<1x64xf32, #tpu.memory_space<vmem>>, vector<1x64xf32>
    %4 = vector.broadcast %3 : vector<1x64xf32> to vector<16x64xf32>
    %5 = arith.addf %2, %4 : vector<16x64xf32>
    %c0_5 = arith.constant 0 : index
    %c0_6 = arith.constant 0 : index
    %6 = vector.load %arg5[%c0_5, %c0_6] : memref<16x64xf32, #tpu.memory_space<vmem>>, vector<16x64xf32>
    %7 = arith.addf %5, %6 : vector<16x64xf32>
    %c0_7 = arith.constant 0 : index
    %c0_8 = arith.constant 0 : index
    %8 = vector.load %arg6[%c0_7, %c0_8] : memref<16x64xf32, #tpu.memory_space<vmem>>, vector<16x64xf32>
    tpu.vector_store %arg6[%c0_7, %c0_8], %7 {strides = array<i32>} : memref<16x64xf32, #tpu.memory_space<vmem>>, vector<16x64xf32>,
    return
  }
  func.func @transform_0(%arg0: i32, %arg1: i32) -> (i32, i32) {
    %c0_i32 = arith.constant 0 : i32
    %c0_i32_0 = arith.constant 0 : i32
    return %arg0, %c0_i32 : i32, i32
  }
  func.func @transform_1(%arg0: i32, %arg1: i32) -> (i32, i32) {
    %c0_i32 = arith.constant 0 : i32
    %c0_i32_0 = arith.constant 0 : i32
    return %c0_i32, %arg1 : i32, i32
  }
  func.func @transform_2(%arg0: i32, %arg1: i32) -> (i32, i32) {
    %c0_i32 = arith.constant 0 : i32
    %c0_i32_0 = arith.constant 0 : i32
    return %c0_i32, %arg1 : i32, i32
  }
  func.func @transform_3(%arg0: i32, %arg1: i32) -> (i32, i32) {
    %c0_i32 = arith.constant 0 : i32
    return %arg0, %arg1 : i32, i32
  }
  func.func @transform_4(%arg0: i32, %arg1: i32) -> (i32, i32) {
    %c0_i32 = arith.constant 0 : i32
    return %arg0, %arg1 : i32, i32
  }
}

module attributes {stable_mosaic.version = 11 : i64} {
  func.func @_ln_linear_kernel(%arg0: i32, %arg1: i32, %arg2: memref<16x64xf32, #tpu.memory_space<vmem>>, %arg3: memref<1x64xf32, #tpu.memory_space<vmem>>, %arg4: memref<1x64xf32, #tpu.memory_space<vmem>>, %arg5: memref<64x64xbf16, #tpu.memory_space<vmem>>, %arg6: memref<1x64xf32, #tpu.memory_space<vmem>>, %arg7: memref<16x64xbf16, #tpu.memory_space<vmem>>) attributes {dimension_semantics = [#tpu.dimension_semantics<parallel>, #tpu.dimension_semantics<parallel>], iteration_bounds = array<i64: 1, 1>, scalar_prefetch = 0 : i64, scratch_operands = 0 : i64, tpu.core_type = #tpu.core_type<tc>, window_params = [{transform_indices = @transform_0, window_bounds = array<i64: 16, 64>}, {pipeline_mode = #tpu.pipeline_mode<synchronous>, transform_indices = @transform_1, window_bounds = array<i64: 1, 64>}, {pipeline_mode = #tpu.pipeline_mode<synchronous>, transform_indices = @transform_2, window_bounds = array<i64: 1, 64>}, {transform_indices = @transform_3, window_bounds = array<i64: 64, 64>}, {transform_indices = @transform_4, window_bounds = array<i64: 1, 64>}, {transform_indices = @transform_5, window_bounds = array<i64: 16, 64>}]} {
    %c0 = arith.constant 0 : index
    %c0_0 = arith.constant 0 : index
    %0 = vector.load %arg2[%c0, %c0_0] : memref<16x64xf32, #tpu.memory_space<vmem>>, vector<16x64xf32>
    %cst = arith.constant dense<0.000000e+00> : vector<16xf32>
    %1 = vector.multi_reduction <add>, %0, %cst [1] : vector<16x64xf32> to vector<16xf32>
    %2 = vector.shape_cast %1 : vector<16xf32> to vector<16x1xf32>
    %cst_1 = arith.constant 6.400000e+01 : f32
    %3 = vector.broadcast %cst_1 : f32 to vector<16x1xf32>
    %4 = arith.divf %2, %3 : vector<16x1xf32>
    %5 = vector.broadcast %4 : vector<16x1xf32> to vector<16x64xf32>
    %6 = arith.subf %0, %5 : vector<16x64xf32>
    %7 = arith.mulf %6, %6 : vector<16x64xf32>
    %cst_2 = arith.constant dense<0.000000e+00> : vector<16xf32>
    %8 = vector.multi_reduction <add>, %7, %cst_2 [1] : vector<16x64xf32> to vector<16xf32>
    %9 = vector.shape_cast %8 : vector<16xf32> to vector<16x1xf32>
    %cst_3 = arith.constant 6.400000e+01 : f32
    %10 = vector.broadcast %cst_3 : f32 to vector<16x1xf32>
    %11 = arith.divf %9, %10 : vector<16x1xf32>
    %cst_4 = arith.constant 9.99999974E-6 : f32
    %12 = vector.broadcast %cst_4 : f32 to vector<16x1xf32>
    %13 = arith.addf %11, %12 : vector<16x1xf32>
    %14 = math.rsqrt %13 : vector<16x1xf32>
    %15 = vector.broadcast %14 : vector<16x1xf32> to vector<16x64xf32>
    %16 = arith.mulf %6, %15 : vector<16x64xf32>
    %c0_5 = arith.constant 0 : index
    %c0_6 = arith.constant 0 : index
    %17 = vector.load %arg3[%c0_5, %c0_6] : memref<1x64xf32, #tpu.memory_space<vmem>>, vector<1x64xf32>
    %18 = vector.broadcast %17 : vector<1x64xf32> to vector<16x64xf32>
    %19 = arith.mulf %16, %18 : vector<16x64xf32>
    %c0_7 = arith.constant 0 : index
    %c0_8 = arith.constant 0 : index
    %20 = vector.load %arg4[%c0_7, %c0_8] : memref<1x64xf32, #tpu.memory_space<vmem>>, vector<1x64xf32>
    %21 = vector.broadcast %20 : vector<1x64xf32> to vector<16x64xf32>
    %22 = arith.addf %19, %21 : vector<16x64xf32>
    %23 = arith.truncf %22 : vector<16x64xf32> to vector<16x64xbf16>
    %c0_9 = arith.constant 0 : index
    %c0_10 = arith.constant 0 : index
    %24 = vector.load %arg5[%c0_9, %c0_10] : memref<64x64xbf16, #tpu.memory_space<vmem>>, vector<64x64xbf16>
    %cst_11 = arith.constant dense<0.000000e+00> : vector<16x64xf32>
    %25 = tpu.matmul %23, %24, %cst_11 {dimension_numbers = #tpu.dot_dimension_numbers<[1], [0], [0], [1], [0, 0, 1, 1], [], []>} : vector<16x64xbf16>, vector<64x64xbf16>, vector<16x64xf32> -> vector<16x64xf32>
    %c0_12 = arith.constant 0 : index
    %c0_13 = arith.constant 0 : index
    %26 = vector.load %arg6[%c0_12, %c0_13] : memref<1x64xf32, #tpu.memory_space<vmem>>, vector<1x64xf32>
    %27 = vector.broadcast %26 : vector<1x64xf32> to vector<16x64xf32>
    %28 = arith.addf %25, %27 : vector<16x64xf32>
    %29 = arith.truncf %28 : vector<16x64xf32> to vector<16x64xbf16>
    %c0_14 = arith.constant 0 : index
    %c0_15 = arith.constant 0 : index
    %30 = vector.load %arg7[%c0_14, %c0_15] : memref<16x64xbf16, #tpu.memory_space<vmem>>, vector<16x64xbf16>
    tpu.vector_store %arg7[%c0_14, %c0_15], %29 {strides = array<i32>} : memref<16x64xbf16, #tpu.memory_space<vmem>>, vector<16x64xbf16>,
    return
  }
  func.func @transform_0(%arg0: i32, %arg1: i32) -> (i32, i32) {
    %c0_i32 = arith.constant 0 : i32
    %c0_i32_0 = arith.constant 0 : i32
    return %arg0, %c0_i32 : i32, i32
  }
  func.func @transform_1(%arg0: i32, %arg1: i32) -> (i32, i32) {
    %c0_i32 = arith.constant 0 : i32
    %c0_i32_0 = arith.constant 0 : i32
    %c0_i32_1 = arith.constant 0 : i32
    return %c0_i32, %c0_i32_0 : i32, i32
  }
  func.func @transform_2(%arg0: i32, %arg1: i32) -> (i32, i32) {
    %c0_i32 = arith.constant 0 : i32
    %c0_i32_0 = arith.constant 0 : i32
    %c0_i32_1 = arith.constant 0 : i32
    return %c0_i32, %c0_i32_0 : i32, i32
  }
  func.func @transform_3(%arg0: i32, %arg1: i32) -> (i32, i32) {
    %c0_i32 = arith.constant 0 : i32
    %c0_i32_0 = arith.constant 0 : i32
    return %c0_i32, %arg1 : i32, i32
  }
  func.func @transform_4(%arg0: i32, %arg1: i32) -> (i32, i32) {
    %c0_i32 = arith.constant 0 : i32
    %c0_i32_0 = arith.constant 0 : i32
    return %c0_i32, %arg1 : i32, i32
  }
  func.func @transform_5(%arg0: i32, %arg1: i32) -> (i32, i32) {
    %c0_i32 = arith.constant 0 : i32
    return %arg0, %arg1 : i32, i32
  }
}

module attributes {stable_mosaic.version = 11 : i64} {
  func.func @_matmul_bias_kernel(%arg0: i32, %arg1: i32, %arg2: i32, %arg3: memref<16x64xbf16, #tpu.memory_space<vmem>>, %arg4: memref<64x256xbf16, #tpu.memory_space<vmem>>, %arg5: memref<1x256xf32, #tpu.memory_space<vmem>>, %arg6: memref<16x256xbf16, #tpu.memory_space<vmem>>) attributes {dimension_semantics = [#tpu.dimension_semantics<parallel>, #tpu.dimension_semantics<parallel>, #tpu.dimension_semantics<arbitrary>], iteration_bounds = array<i64: 1, 1, 1>, scalar_prefetch = 0 : i64, scratch_operands = 0 : i64, tpu.core_type = #tpu.core_type<tc>, window_params = [{transform_indices = @transform_0, window_bounds = array<i64: 16, 64>}, {transform_indices = @transform_1, window_bounds = array<i64: 64, 256>}, {transform_indices = @transform_2, window_bounds = array<i64: 1, 256>}, {transform_indices = @transform_3, window_bounds = array<i64: 16, 256>}]} {
    %c0_i32 = arith.constant 0 : i32
    %0 = arith.cmpi eq, %arg2, %c0_i32 : i32
    %1 = arith.extui %0 : i1 to i32
    %c0_i32_0 = arith.constant 0 : i32
    %2 = arith.cmpi ne, %1, %c0_i32_0 : i32
    scf.if %2 {
      %c0_8 = arith.constant 0 : index
      %c0_9 = arith.constant 0 : index
      %11 = vector.load %arg5[%c0_8, %c0_9] : memref<1x256xf32, #tpu.memory_space<vmem>>, vector<1x256xf32>
      %12 = vector.shape_cast %11 : vector<1x256xf32> to vector<1x256xf32>
      %13 = vector.broadcast %12 : vector<1x256xf32> to vector<16x256xf32>
      %14 = arith.truncf %13 : vector<16x256xf32> to vector<16x256xbf16>
      %c0_10 = arith.constant 0 : index
      %c0_11 = arith.constant 0 : index
      %15 = vector.load %arg6[%c0_10, %c0_11] : memref<16x256xbf16, #tpu.memory_space<vmem>>, vector<16x256xbf16>
      tpu.vector_store %arg6[%c0_10, %c0_11], %14 {strides = array<i32>} : memref<16x256xbf16, #tpu.memory_space<vmem>>, vector<16x256xbf16>,
    } else {
    }
    %c0 = arith.constant 0 : index
    %c0_1 = arith.constant 0 : index
    %3 = vector.load %arg6[%c0, %c0_1] : memref<16x256xbf16, #tpu.memory_space<vmem>>, vector<16x256xbf16>
    %4 = arith.extf %3 : vector<16x256xbf16> to vector<16x256xf32>
    %c0_2 = arith.constant 0 : index
    %c0_3 = arith.constant 0 : index
    %5 = vector.load %arg3[%c0_2, %c0_3] : memref<16x64xbf16, #tpu.memory_space<vmem>>, vector<16x64xbf16>
    %c0_4 = arith.constant 0 : index
    %c0_5 = arith.constant 0 : index
    %6 = vector.load %arg4[%c0_4, %c0_5] : memref<64x256xbf16, #tpu.memory_space<vmem>>, vector<64x256xbf16>
    %cst = arith.constant dense<0.000000e+00> : vector<16x256xf32>
    %7 = tpu.matmul %5, %6, %cst {dimension_numbers = #tpu.dot_dimension_numbers<[1], [0], [0], [1], [0, 0, 1, 1], [], []>} : vector<16x64xbf16>, vector<64x256xbf16>, vector<16x256xf32> -> vector<16x256xf32>
    %8 = arith.addf %4, %7 : vector<16x256xf32>
    %9 = arith.truncf %8 : vector<16x256xf32> to vector<16x256xbf16>
    %c0_6 = arith.constant 0 : index
    %c0_7 = arith.constant 0 : index
    %10 = vector.load %arg6[%c0_6, %c0_7] : memref<16x256xbf16, #tpu.memory_space<vmem>>, vector<16x256xbf16>
    tpu.vector_store %arg6[%c0_6, %c0_7], %9 {strides = array<i32>} : memref<16x256xbf16, #tpu.memory_space<vmem>>, vector<16x256xbf16>,
    return
  }
  func.func @transform_0(%arg0: i32, %arg1: i32, %arg2: i32) -> (i32, i32) {
    %c0_i32 = arith.constant 0 : i32
    return %arg0, %arg2 : i32, i32
  }
  func.func @transform_1(%arg0: i32, %arg1: i32, %arg2: i32) -> (i32, i32) {
    %c0_i32 = arith.constant 0 : i32
    return %arg2, %arg1 : i32, i32
  }
  func.func @transform_2(%arg0: i32, %arg1: i32, %arg2: i32) -> (i32, i32) {
    %c0_i32 = arith.constant 0 : i32
    %c0_i32_0 = arith.constant 0 : i32
    return %c0_i32, %arg1 : i32, i32
  }
  func.func @transform_3(%arg0: i32, %arg1: i32, %arg2: i32) -> (i32, i32) {
    %c0_i32 = arith.constant 0 : i32
    return %arg0, %arg1 : i32, i32
  }
}

module attributes {stable_mosaic.version = 11 : i64} {
  func.func @_layernorm_kernel(%arg0: i32, %arg1: memref<16x64xf32, #tpu.memory_space<vmem>>, %arg2: memref<1x64xf32, #tpu.memory_space<vmem>>, %arg3: memref<1x64xf32, #tpu.memory_space<vmem>>, %arg4: memref<16x64xf32, #tpu.memory_space<vmem>>) attributes {dimension_semantics = [#tpu.dimension_semantics<parallel>], iteration_bounds = array<i64: 1>, scalar_prefetch = 0 : i64, scratch_operands = 0 : i64, tpu.core_type = #tpu.core_type<tc>, window_params = [{transform_indices = @transform_0, window_bounds = array<i64: 16, 64>}, {pipeline_mode = #tpu.pipeline_mode<synchronous>, transform_indices = @transform_1, window_bounds = array<i64: 1, 64>}, {pipeline_mode = #tpu.pipeline_mode<synchronous>, transform_indices = @transform_2, window_bounds = array<i64: 1, 64>}, {transform_indices = @transform_3, window_bounds = array<i64: 16, 64>}]} {
    %c0 = arith.constant 0 : index
    %c0_0 = arith.constant 0 : index
    %0 = vector.load %arg1[%c0, %c0_0] : memref<16x64xf32, #tpu.memory_space<vmem>>, vector<16x64xf32>
    %cst = arith.constant dense<0.000000e+00> : vector<16xf32>
    %1 = vector.multi_reduction <add>, %0, %cst [1] : vector<16x64xf32> to vector<16xf32>
    %2 = vector.shape_cast %1 : vector<16xf32> to vector<16x1xf32>
    %cst_1 = arith.constant 6.400000e+01 : f32
    %3 = vector.broadcast %cst_1 : f32 to vector<16x1xf32>
    %4 = arith.divf %2, %3 : vector<16x1xf32>
    %5 = vector.broadcast %4 : vector<16x1xf32> to vector<16x64xf32>
    %6 = arith.subf %0, %5 : vector<16x64xf32>
    %7 = arith.mulf %6, %6 : vector<16x64xf32>
    %cst_2 = arith.constant dense<0.000000e+00> : vector<16xf32>
    %8 = vector.multi_reduction <add>, %7, %cst_2 [1] : vector<16x64xf32> to vector<16xf32>
    %9 = vector.shape_cast %8 : vector<16xf32> to vector<16x1xf32>
    %cst_3 = arith.constant 6.400000e+01 : f32
    %10 = vector.broadcast %cst_3 : f32 to vector<16x1xf32>
    %11 = arith.divf %9, %10 : vector<16x1xf32>
    %cst_4 = arith.constant 9.99999974E-6 : f32
    %12 = vector.broadcast %cst_4 : f32 to vector<16x1xf32>
    %13 = arith.addf %11, %12 : vector<16x1xf32>
    %14 = math.rsqrt %13 : vector<16x1xf32>
    %15 = vector.broadcast %14 : vector<16x1xf32> to vector<16x64xf32>
    %16 = arith.mulf %6, %15 : vector<16x64xf32>
    %c0_5 = arith.constant 0 : index
    %c0_6 = arith.constant 0 : index
    %17 = vector.load %arg2[%c0_5, %c0_6] : memref<1x64xf32, #tpu.memory_space<vmem>>, vector<1x64xf32>
    %18 = vector.broadcast %17 : vector<1x64xf32> to vector<16x64xf32>
    %19 = arith.mulf %16, %18 : vector<16x64xf32>
    %c0_7 = arith.constant 0 : index
    %c0_8 = arith.constant 0 : index
    %20 = vector.load %arg3[%c0_7, %c0_8] : memref<1x64xf32, #tpu.memory_space<vmem>>, vector<1x64xf32>
    %21 = vector.broadcast %20 : vector<1x64xf32> to vector<16x64xf32>
    %22 = arith.addf %19, %21 : vector<16x64xf32>
    %c0_9 = arith.constant 0 : index
    %c0_10 = arith.constant 0 : index
    %23 = vector.load %arg4[%c0_9, %c0_10] : memref<16x64xf32, #tpu.memory_space<vmem>>, vector<16x64xf32>
    tpu.vector_store %arg4[%c0_9, %c0_10], %22 {strides = array<i32>} : memref<16x64xf32, #tpu.memory_space<vmem>>, vector<16x64xf32>,
    return
  }
  func.func @transform_0(%arg0: i32) -> (i32, i32) {
    %c0_i32 = arith.constant 0 : i32
    %c0_i32_0 = arith.constant 0 : i32
    return %arg0, %c0_i32 : i32, i32
  }
  func.func @transform_1(%arg0: i32) -> (i32, i32) {
    %c0_i32 = arith.constant 0 : i32
    %c0_i32_0 = arith.constant 0 : i32
    %c0_i32_1 = arith.constant 0 : i32
    return %c0_i32, %c0_i32_0 : i32, i32
  }
  func.func @transform_2(%arg0: i32) -> (i32, i32) {
    %c0_i32 = arith.constant 0 : i32
    %c0_i32_0 = arith.constant 0 : i32
    %c0_i32_1 = arith.constant 0 : i32
    return %c0_i32, %c0_i32_0 : i32, i32
  }
  func.func @transform_3(%arg0: i32) -> (i32, i32) {
    %c0_i32 = arith.constant 0 : i32
    %c0_i32_0 = arith.constant 0 : i32
    return %arg0, %c0_i32 : i32, i32
  }
}

module attributes {stable_mosaic.version = 11 : i64} {
  func.func @_cross_attn_kernel(%arg0: i32, %arg1: memref<1x4x8x16xbf16, #tpu.memory_space<vmem>>, %arg2: memref<1x4x8x16xbf16, #tpu.memory_space<vmem>>, %arg3: memref<1x4x8x16xbf16, #tpu.memory_space<vmem>>, %arg4: memref<1x1x8xf32, #tpu.memory_space<vmem>>, %arg5: memref<1x4x8x16xbf16, #tpu.memory_space<vmem>>) attributes {dimension_semantics = [#tpu.dimension_semantics<parallel>], iteration_bounds = array<i64: 2>, scalar_prefetch = 0 : i64, scratch_operands = 0 : i64, tpu.core_type = #tpu.core_type<tc>, window_params = [{transform_indices = @transform_0, window_bounds = array<i64: 1, 4, 8, 16>}, {transform_indices = @transform_1, window_bounds = array<i64: 1, 4, 8, 16>}, {transform_indices = @transform_2, window_bounds = array<i64: 1, 4, 8, 16>}, {transform_indices = @transform_3, window_bounds = array<i64: 1, 1, 8>}, {transform_indices = @transform_4, window_bounds = array<i64: 1, 4, 8, 16>}]} {
    %c0 = arith.constant 0 : index
    %c0_0 = arith.constant 0 : index
    %c0_1 = arith.constant 0 : index
    %c0_2 = arith.constant 0 : index
    %0 = vector.load %arg1[%c0, %c0_0, %c0_1, %c0_2] : memref<1x4x8x16xbf16, #tpu.memory_space<vmem>>, vector<1x4x8x16xbf16>
    %1 = vector.shape_cast %0 : vector<1x4x8x16xbf16> to vector<4x8x16xbf16>
    %c0_3 = arith.constant 0 : index
    %c0_4 = arith.constant 0 : index
    %c0_5 = arith.constant 0 : index
    %c0_6 = arith.constant 0 : index
    %2 = vector.load %arg2[%c0_3, %c0_4, %c0_5, %c0_6] : memref<1x4x8x16xbf16, #tpu.memory_space<vmem>>, vector<1x4x8x16xbf16>
    %3 = vector.shape_cast %2 : vector<1x4x8x16xbf16> to vector<4x8x16xbf16>
    %c0_7 = arith.constant 0 : index
    %c0_8 = arith.constant 0 : index
    %c0_9 = arith.constant 0 : index
    %c0_10 = arith.constant 0 : index
    %4 = vector.load %arg3[%c0_7, %c0_8, %c0_9, %c0_10] : memref<1x4x8x16xbf16, #tpu.memory_space<vmem>>, vector<1x4x8x16xbf16>
    %5 = vector.shape_cast %4 : vector<1x4x8x16xbf16> to vector<4x8x16xbf16>
    %c0_11 = arith.constant 0 : index
    %c0_12 = arith.constant 0 : index
    %c0_13 = arith.constant 0 : index
    %6 = vector.load %arg4[%c0_11, %c0_12, %c0_13] : memref<1x1x8xf32, #tpu.memory_space<vmem>>, vector<1x1x8xf32>
    %7 = vector.shape_cast %6 : vector<1x1x8xf32> to vector<1x8xf32>
    "tpu.trace_start"() <{level = 10 : i32, message = "hqd,hkd->hqk"}> : () -> ()
    %cst = arith.constant dense<0.000000e+00> : vector<4x8x8xf32>
    %8 = tpu.matmul %1, %3, %cst {dimension_numbers = #tpu.dot_dimension_numbers<[2], [2], [1], [1], [0, 0, 0, 1, 1, 1], [0], [0]>} : vector<4x8x16xbf16>, vector<4x8x16xbf16>, vector<4x8x8xf32> -> vector<4x8x8xf32>
    "tpu.trace_stop"() : () -> ()
    %9 = vector.shape_cast %7 : vector<1x8xf32> to vector<1x1x8xf32>
    %10 = vector.broadcast %9 : vector<1x1x8xf32> to vector<4x8x8xf32>
    %11 = arith.addf %8, %10 : vector<4x8x8xf32>
    %cst_14 = arith.constant dense<0xFF800000> : vector<4x8xf32>
    %12 = vector.multi_reduction <maximumf>, %11, %cst_14 [2] : vector<4x8x8xf32> to vector<4x8xf32>
    %13 = vector.shape_cast %12 : vector<4x8xf32> to vector<4x8x1xf32>
    %14 = tpu.weird %13 : vector<4x8x1xf32> -> vector<4x8x1xi1>
    %cst_15 = arith.constant dense<true> : vector<4x8x1xi1>
    %15 = arith.xori %14, %cst_15 : vector<4x8x1xi1>
    %cst_16 = arith.constant 0.000000e+00 : f32
    %16 = vector.broadcast %cst_16 : f32 to vector<4x8x1xf32>
    %17 = arith.select %15, %13, %16 : vector<4x8x1xi1>, vector<4x8x1xf32>
    %18 = vector.broadcast %17 : vector<4x8x1xf32> to vector<4x8x8xf32>
    %19 = arith.subf %11, %18 : vector<4x8x8xf32>
    %20 = math.exp %19 : vector<4x8x8xf32>
    %cst_17 = arith.constant dense<0.000000e+00> : vector<4x8xf32>
    %21 = vector.multi_reduction <add>, %20, %cst_17 [2] : vector<4x8x8xf32> to vector<4x8xf32>
    %22 = vector.shape_cast %21 : vector<4x8xf32> to vector<4x8x1xf32>
    %cst_18 = arith.constant 0.000000e+00 : f32
    %23 = vector.broadcast %cst_18 : f32 to vector<4x8x1xf32>
    %24 = arith.cmpf oeq, %22, %23 : vector<4x8x1xf32>
    %cst_19 = arith.constant 1.000000e+00 : f32
    %25 = vector.broadcast %cst_19 : f32 to vector<4x8x1xf32>
    %26 = arith.select %24, %25, %22 : vector<4x8x1xi1>, vector<4x8x1xf32>
    %27 = tpu.reciprocal %26 {approx = true} : vector<4x8x1xf32> -> vector<4x8x1xf32>
    %28 = vector.broadcast %27 : vector<4x8x1xf32> to vector<4x8x8xf32>
    %29 = arith.mulf %20, %28 : vector<4x8x8xf32>
    %30 = arith.truncf %29 : vector<4x8x8xf32> to vector<4x8x8xbf16>
    "tpu.trace_start"() <{level = 10 : i32, message = "hqk,hkd->hqd"}> : () -> ()
    %cst_20 = arith.constant dense<0.000000e+00> : vector<4x8x16xf32>
    %31 = tpu.matmul %30, %5, %cst_20 {dimension_numbers = #tpu.dot_dimension_numbers<[2], [1], [1], [2], [0, 0, 0, 1, 1, 2], [0], [0]>} : vector<4x8x8xbf16>, vector<4x8x16xbf16>, vector<4x8x16xf32> -> vector<4x8x16xf32>
    "tpu.trace_stop"() : () -> ()
    %32 = arith.truncf %31 : vector<4x8x16xf32> to vector<4x8x16xbf16>
    %c0_21 = arith.constant 0 : index
    %c0_22 = arith.constant 0 : index
    %c0_23 = arith.constant 0 : index
    %c0_24 = arith.constant 0 : index
    %33 = vector.load %arg5[%c0_21, %c0_22, %c0_23, %c0_24] : memref<1x4x8x16xbf16, #tpu.memory_space<vmem>>, vector<1x4x8x16xbf16>
    %34 = vector.shape_cast %33 : vector<1x4x8x16xbf16> to vector<4x8x16xbf16>
    %35 = vector.shape_cast %32 : vector<4x8x16xbf16> to vector<1x4x8x16xbf16>
    tpu.vector_store %arg5[%c0_21, %c0_22, %c0_23, %c0_24], %35 {strides = array<i32>} : memref<1x4x8x16xbf16, #tpu.memory_space<vmem>>, vector<1x4x8x16xbf16>,
    return
  }
  func.func @transform_0(%arg0: i32) -> (i32, i32, i32, i32) {
    %c0_i32 = arith.constant 0 : i32
    %c0_i32_0 = arith.constant 0 : i32
    %c0_i32_1 = arith.constant 0 : i32
    %c0_i32_2 = arith.constant 0 : i32
    return %arg0, %c0_i32, %c0_i32_0, %c0_i32_1 : i32, i32, i32, i32
  }
  func.func @transform_1(%arg0: i32) -> (i32, i32, i32, i32) {
    %c0_i32 = arith.constant 0 : i32
    %c0_i32_0 = arith.constant 0 : i32
    %c0_i32_1 = arith.constant 0 : i32
    %c0_i32_2 = arith.constant 0 : i32
    return %arg0, %c0_i32, %c0_i32_0, %c0_i32_1 : i32, i32, i32, i32
  }
  func.func @transform_2(%arg0: i32) -> (i32, i32, i32, i32) {
    %c0_i32 = arith.constant 0 : i32
    %c0_i32_0 = arith.constant 0 : i32
    %c0_i32_1 = arith.constant 0 : i32
    %c0_i32_2 = arith.constant 0 : i32
    return %arg0, %c0_i32, %c0_i32_0, %c0_i32_1 : i32, i32, i32, i32
  }
  func.func @transform_3(%arg0: i32) -> (i32, i32, i32) {
    %c0_i32 = arith.constant 0 : i32
    %c0_i32_0 = arith.constant 0 : i32
    %c0_i32_1 = arith.constant 0 : i32
    return %arg0, %c0_i32, %c0_i32_0 : i32, i32, i32
  }
  func.func @transform_4(%arg0: i32) -> (i32, i32, i32, i32) {
    %c0_i32 = arith.constant 0 : i32
    %c0_i32_0 = arith.constant 0 : i32
    %c0_i32_1 = arith.constant 0 : i32
    %c0_i32_2 = arith.constant 0 : i32
    return %arg0, %c0_i32, %c0_i32_0, %c0_i32_1 : i32, i32, i32, i32
  }
}

module attributes {stable_mosaic.version = 11 : i64} {
  func.func @_ln_linear_kernel(%arg0: i32, %arg1: i32, %arg2: memref<16x64xf32, #tpu.memory_space<vmem>>, %arg3: memref<1x64xf32, #tpu.memory_space<vmem>>, %arg4: memref<1x64xf32, #tpu.memory_space<vmem>>, %arg5: memref<64x64xbf16, #tpu.memory_space<vmem>>, %arg6: memref<1x64xf32, #tpu.memory_space<vmem>>, %arg7: memref<16x64xbf16, #tpu.memory_space<vmem>>) attributes {dimension_semantics = [#tpu.dimension_semantics<parallel>, #tpu.dimension_semantics<parallel>], iteration_bounds = array<i64: 1, 1>, scalar_prefetch = 0 : i64, scratch_operands = 0 : i64, tpu.core_type = #tpu.core_type<tc>, window_params = [{transform_indices = @transform_0, window_bounds = array<i64: 16, 64>}, {pipeline_mode = #tpu.pipeline_mode<synchronous>, transform_indices = @transform_1, window_bounds = array<i64: 1, 64>}, {pipeline_mode = #tpu.pipeline_mode<synchronous>, transform_indices = @transform_2, window_bounds = array<i64: 1, 64>}, {transform_indices = @transform_3, window_bounds = array<i64: 64, 64>}, {transform_indices = @transform_4, window_bounds = array<i64: 1, 64>}, {transform_indices = @transform_5, window_bounds = array<i64: 16, 64>}]} {
    %c0 = arith.constant 0 : index
    %c0_0 = arith.constant 0 : index
    %0 = vector.load %arg2[%c0, %c0_0] : memref<16x64xf32, #tpu.memory_space<vmem>>, vector<16x64xf32>
    %cst = arith.constant dense<0.000000e+00> : vector<16xf32>
    %1 = vector.multi_reduction <add>, %0, %cst [1] : vector<16x64xf32> to vector<16xf32>
    %2 = vector.shape_cast %1 : vector<16xf32> to vector<16x1xf32>
    %cst_1 = arith.constant 6.400000e+01 : f32
    %3 = vector.broadcast %cst_1 : f32 to vector<16x1xf32>
    %4 = arith.divf %2, %3 : vector<16x1xf32>
    %5 = vector.broadcast %4 : vector<16x1xf32> to vector<16x64xf32>
    %6 = arith.subf %0, %5 : vector<16x64xf32>
    %7 = arith.mulf %6, %6 : vector<16x64xf32>
    %cst_2 = arith.constant dense<0.000000e+00> : vector<16xf32>
    %8 = vector.multi_reduction <add>, %7, %cst_2 [1] : vector<16x64xf32> to vector<16xf32>
    %9 = vector.shape_cast %8 : vector<16xf32> to vector<16x1xf32>
    %cst_3 = arith.constant 6.400000e+01 : f32
    %10 = vector.broadcast %cst_3 : f32 to vector<16x1xf32>
    %11 = arith.divf %9, %10 : vector<16x1xf32>
    %cst_4 = arith.constant 9.99999974E-6 : f32
    %12 = vector.broadcast %cst_4 : f32 to vector<16x1xf32>
    %13 = arith.addf %11, %12 : vector<16x1xf32>
    %14 = math.rsqrt %13 : vector<16x1xf32>
    %15 = vector.broadcast %14 : vector<16x1xf32> to vector<16x64xf32>
    %16 = arith.mulf %6, %15 : vector<16x64xf32>
    %c0_5 = arith.constant 0 : index
    %c0_6 = arith.constant 0 : index
    %17 = vector.load %arg3[%c0_5, %c0_6] : memref<1x64xf32, #tpu.memory_space<vmem>>, vector<1x64xf32>
    %18 = vector.broadcast %17 : vector<1x64xf32> to vector<16x64xf32>
    %19 = arith.mulf %16, %18 : vector<16x64xf32>
    %c0_7 = arith.constant 0 : index
    %c0_8 = arith.constant 0 : index
    %20 = vector.load %arg4[%c0_7, %c0_8] : memref<1x64xf32, #tpu.memory_space<vmem>>, vector<1x64xf32>
    %21 = vector.broadcast %20 : vector<1x64xf32> to vector<16x64xf32>
    %22 = arith.addf %19, %21 : vector<16x64xf32>
    %23 = arith.truncf %22 : vector<16x64xf32> to vector<16x64xbf16>
    %c0_9 = arith.constant 0 : index
    %c0_10 = arith.constant 0 : index
    %24 = vector.load %arg5[%c0_9, %c0_10] : memref<64x64xbf16, #tpu.memory_space<vmem>>, vector<64x64xbf16>
    %cst_11 = arith.constant dense<0.000000e+00> : vector<16x64xf32>
    %25 = tpu.matmul %23, %24, %cst_11 {dimension_numbers = #tpu.dot_dimension_numbers<[1], [0], [0], [1], [0, 0, 1, 1], [], []>} : vector<16x64xbf16>, vector<64x64xbf16>, vector<16x64xf32> -> vector<16x64xf32>
    %c0_12 = arith.constant 0 : index
    %c0_13 = arith.constant 0 : index
    %26 = vector.load %arg6[%c0_12, %c0_13] : memref<1x64xf32, #tpu.memory_space<vmem>>, vector<1x64xf32>
    %27 = vector.broadcast %26 : vector<1x64xf32> to vector<16x64xf32>
    %28 = arith.addf %25, %27 : vector<16x64xf32>
    %cst_14 = arith.constant 0.000000e+00 : f32
    %29 = vector.broadcast %cst_14 : f32 to vector<16x64xf32>
    %30 = arith.maximumf %28, %29 : vector<16x64xf32>
    %31 = arith.truncf %30 : vector<16x64xf32> to vector<16x64xbf16>
    %c0_15 = arith.constant 0 : index
    %c0_16 = arith.constant 0 : index
    %32 = vector.load %arg7[%c0_15, %c0_16] : memref<16x64xbf16, #tpu.memory_space<vmem>>, vector<16x64xbf16>
    tpu.vector_store %arg7[%c0_15, %c0_16], %31 {strides = array<i32>} : memref<16x64xbf16, #tpu.memory_space<vmem>>, vector<16x64xbf16>,
    return
  }
  func.func @transform_0(%arg0: i32, %arg1: i32) -> (i32, i32) {
    %c0_i32 = arith.constant 0 : i32
    %c0_i32_0 = arith.constant 0 : i32
    return %arg0, %c0_i32 : i32, i32
  }
  func.func @transform_1(%arg0: i32, %arg1: i32) -> (i32, i32) {
    %c0_i32 = arith.constant 0 : i32
    %c0_i32_0 = arith.constant 0 : i32
    %c0_i32_1 = arith.constant 0 : i32
    return %c0_i32, %c0_i32_0 : i32, i32
  }
  func.func @transform_2(%arg0: i32, %arg1: i32) -> (i32, i32) {
    %c0_i32 = arith.constant 0 : i32
    %c0_i32_0 = arith.constant 0 : i32
    %c0_i32_1 = arith.constant 0 : i32
    return %c0_i32, %c0_i32_0 : i32, i32
  }
  func.func @transform_3(%arg0: i32, %arg1: i32) -> (i32, i32) {
    %c0_i32 = arith.constant 0 : i32
    %c0_i32_0 = arith.constant 0 : i32
    return %c0_i32, %arg1 : i32, i32
  }
  func.func @transform_4(%arg0: i32, %arg1: i32) -> (i32, i32) {
    %c0_i32 = arith.constant 0 : i32
    %c0_i32_0 = arith.constant 0 : i32
    return %c0_i32, %arg1 : i32, i32
  }
  func.func @transform_5(%arg0: i32, %arg1: i32) -> (i32, i32) {
    %c0_i32 = arith.constant 0 : i32
    return %arg0, %arg1 : i32, i32
  }
}

module attributes {stable_mosaic.version = 11 : i64} {
  func.func @_matmul_bias_kernel(%arg0: i32, %arg1: i32, %arg2: i32, %arg3: memref<16x64xbf16, #tpu.memory_space<vmem>>, %arg4: memref<64x31xbf16, #tpu.memory_space<vmem>>, %arg5: memref<1x31xf32, #tpu.memory_space<vmem>>, %arg6: memref<16x31xf32, #tpu.memory_space<vmem>>) attributes {dimension_semantics = [#tpu.dimension_semantics<parallel>, #tpu.dimension_semantics<parallel>, #tpu.dimension_semantics<arbitrary>], iteration_bounds = array<i64: 1, 1, 1>, scalar_prefetch = 0 : i64, scratch_operands = 0 : i64, tpu.core_type = #tpu.core_type<tc>, window_params = [{transform_indices = @transform_0, window_bounds = array<i64: 16, 64>}, {transform_indices = @transform_1, window_bounds = array<i64: 64, 31>}, {transform_indices = @transform_2, window_bounds = array<i64: 1, 31>}, {transform_indices = @transform_3, window_bounds = array<i64: 16, 31>}]} {
    %c0_i32 = arith.constant 0 : i32
    %0 = arith.cmpi eq, %arg2, %c0_i32 : i32
    %1 = arith.extui %0 : i1 to i32
    %c0_i32_0 = arith.constant 0 : i32
    %2 = arith.cmpi ne, %1, %c0_i32_0 : i32
    scf.if %2 {
      %c0_8 = arith.constant 0 : index
      %c0_9 = arith.constant 0 : index
      %9 = vector.load %arg5[%c0_8, %c0_9] : memref<1x31xf32, #tpu.memory_space<vmem>>, vector<1x31xf32>
      %10 = vector.shape_cast %9 : vector<1x31xf32> to vector<1x31xf32>
      %11 = vector.broadcast %10 : vector<1x31xf32> to vector<16x31xf32>
      %c0_10 = arith.constant 0 : index
      %c0_11 = arith.constant 0 : index
      %12 = vector.load %arg6[%c0_10, %c0_11] : memref<16x31xf32, #tpu.memory_space<vmem>>, vector<16x31xf32>
      tpu.vector_store %arg6[%c0_10, %c0_11], %11 {strides = array<i32>} : memref<16x31xf32, #tpu.memory_space<vmem>>, vector<16x31xf32>,
    } else {
    }
    %c0 = arith.constant 0 : index
    %c0_1 = arith.constant 0 : index
    %3 = vector.load %arg6[%c0, %c0_1] : memref<16x31xf32, #tpu.memory_space<vmem>>, vector<16x31xf32>
    %c0_2 = arith.constant 0 : index
    %c0_3 = arith.constant 0 : index
    %4 = vector.load %arg3[%c0_2, %c0_3] : memref<16x64xbf16, #tpu.memory_space<vmem>>, vector<16x64xbf16>
    %c0_4 = arith.constant 0 : index
    %c0_5 = arith.constant 0 : index
    %5 = vector.load %arg4[%c0_4, %c0_5] : memref<64x31xbf16, #tpu.memory_space<vmem>>, vector<64x31xbf16>
    %cst = arith.constant dense<0.000000e+00> : vector<16x31xf32>
    %6 = tpu.matmul %4, %5, %cst {dimension_numbers = #tpu.dot_dimension_numbers<[1], [0], [0], [1], [0, 0, 1, 1], [], []>} : vector<16x64xbf16>, vector<64x31xbf16>, vector<16x31xf32> -> vector<16x31xf32>
    %7 = arith.addf %3, %6 : vector<16x31xf32>
    %c0_6 = arith.constant 0 : index
    %c0_7 = arith.constant 0 : index
    %8 = vector.load %arg6[%c0_6, %c0_7] : memref<16x31xf32, #tpu.memory_space<vmem>>, vector<16x31xf32>
    tpu.vector_store %arg6[%c0_6, %c0_7], %7 {strides = array<i32>} : memref<16x31xf32, #tpu.memory_space<vmem>>, vector<16x31xf32>,
    return
  }
  func.func @transform_0(%arg0: i32, %arg1: i32, %arg2: i32) -> (i32, i32) {
    %c0_i32 = arith.constant 0 : i32
    return %arg0, %arg2 : i32, i32
  }
  func.func @transform_1(%arg0: i32, %arg1: i32, %arg2: i32) -> (i32, i32) {
    %c0_i32 = arith.constant 0 : i32
    return %arg2, %arg1 : i32, i32
  }
  func.func @transform_2(%arg0: i32, %arg1: i32, %arg2: i32) -> (i32, i32) {
    %c0_i32 = arith.constant 0 : i32
    %c0_i32_0 = arith.constant 0 : i32
    return %c0_i32, %arg1 : i32, i32
  }
  func.func @transform_3(%arg0: i32, %arg1: i32, %arg2: i32) -> (i32, i32) {
    %c0_i32 = arith.constant 0 : i32
    return %arg0, %arg1 : i32, i32
  }
}

</mosaic_0001>

<bundles_post_ra>
// kernel: decoder_transformer_forward.21
= control target key start
LH: loop header
LB: loop body
LE: loop exit
PB: predicated region body
PF: predicated region fallthrough
CT: control target
= control target key end

     0   :  { %vm38_vm0 = vcmask 523264   ;;  %v472_v15 = vmov 0.0   ;;  %vm473_vm1 = vmmov 0   ;;  %vm176_vm2 = vcmask 519168   ;;  %s625_s0 = inlined_call_operand.vmem [shape: f32[16,64], index: 0, kind: input, shape index: {}]   ;;  %s626_s3 = inlined_call_operand.vmem [shape: bf16[64,64], index: 3, kind: input, shape index: {}]   ;;  %s627_s4 = inlined_call_operand.vmem [shape: bf16[64,64], index: 4, kind: input, shape index: {}]   ;;  %s628_s5 = inlined_call_operand.vmem [shape: bf16[64,64], index: 5, kind: input, shape index: {}]   ;;  %s629_s1 = inlined_call_operand.vmem [shape: f32[1,64], index: 1, kind: input, shape index: {}]   ;;  %s630_s2 = inlined_call_operand.vmem [shape: f32[1,64], index: 2, kind: input, shape index: {}]   ;;  %s631_s6 = inlined_call_operand.vmem [shape: f32[1,64], index: 6, kind: input, shape index: {}]   ;;  %s632_s7 = inlined_call_operand.vmem [shape: f32[1,64], index: 7, kind: input, shape index: {}]   ;;  %s633_s9 = inlined_call_operand.vmem [shape: bf16[16,64], index: 9, kind: output, shape index: {0}]   ;;  %s634_s10 = inlined_call_operand.vmem [shape: bf16[16,64], index: 10, kind: output, shape index: {1}]   ;;  %s635_s8 = inlined_call_operand.vmem [shape: f32[1,64], index: 8, kind: input, shape index: {}]   ;;  %s636_s11 = inlined_call_operand.vmem [shape: bf16[16,64], index: 11, kind: output, shape index: {2}]  }
   0x1   :  { %v36_v0 = vld [vmem:[%s625_s0] sm:$0xff]  ;;  %v37_v1 = vld [vmem:[%s625_s0 + $0x8] sm:$0xff]  ;;  %418 = vmatprep.subr.bf16.mxu0 %v472_v15  ;;  %430 = vmatprep.subr.bf16.mxu1 %v472_v15  ;;  %v460_v19 = vld [vmem:[%s626_s3 + $0x10] sm:$0xff]  }
   0x2   :  { %v39_v2 = vsel %vm38_vm0, %v36_v0, 0.0  ;;  %v42_v3 = vsel %vm38_vm0, %v37_v1, 0.0  ;;  %v456_v14 = vld [vmem:[%s626_s3] sm:$0xff]   ;;  %v458_v17 = vld [vmem:[%s626_s3 + $0x8] sm:$0xff]   ;;  %v461_v20 = vld [vmem:[%s627_s4 + $0x10] sm:$0xff]   ;;  %426 = vmatprep.mubr.msk.bf16.mxu0 %vm473_vm1, %v472_v15  ;;  %438 = vmatprep.mubr.msk.bf16.mxu1 %vm473_vm1, %v472_v15 }
   0x3   :  { %40 = vadd.xlane.f32.xlu0 %v39_v2  ;;  %v457_v16 = vld [vmem:[%s627_s4] sm:$0xff]   ;;  %419 = vmatpush3.bf16.msra.mxu0 %v456_v14  ;;  %v459_v18 = vld [vmem:[%s627_s4 + $0x8] sm:$0xff]   ;;  %v462_v21 = vld [vmem:[%s626_s3 + $0x18] sm:$0xff]  }
   0x4   :  { %431 = vmatpush3.bf16.msra.mxu1 %v457_v16  ;;  %420 = vmatprep.subr.bf16.mxu0 %v472_v15  ;;  %v463_v22 = vld [vmem:[%s627_s4 + $0x18] sm:$0xff]   ;;  %v371_v31 = vld [vmem:[%s629_s1] ss:$0 sm:$0xff]  ;;  %v465_v41 = vld [vmem:[%s628_s5 + $0x8] sm:$0xff]  }
   0x5   :  { %432 = vmatprep.subr.bf16.mxu1 %v472_v15  ;;  %v372_v35 = vld [vmem:[%s630_s2] ss:$0 sm:$0xff]  ;;  %v466_v42 = vld [vmem:[%s628_s5 + $0x10] sm:$0xff]   ;;  %v467_v43 = vld [vmem:[%s628_s5 + $0x18] sm:$0xff]  }
   0x6   :  { %v464_v39 = vld [vmem:[%s628_s5] sm:$0xff]  }
   0x7   :  { %43 = vadd.xlane.f32.xlu0 %v42_v3  ;;  %421 = vmatpush3.bf16.msra.mxu0 %v458_v17  ;;  %v373_v44 = vld [vmem:[%s631_s6] ss:$0 sm:$0xff] }
   0x8   :  { %433 = vmatpush3.bf16.msra.mxu1 %v459_v18  ;;  %422 = vmatprep.subr.bf16.mxu0 %v472_v15  ;;  %v381_v45 = vld [vmem:[%s632_s7] ss:$0 sm:$0xff] }
   0x9   :  { %434 = vmatprep.subr.bf16.mxu1 %v472_v15  ;;  %v389_v62 = vld [vmem:[%s635_s8] ss:$0 sm:$0xff] }
   0xb   :  { %423 = vmatpush3.bf16.msra.mxu0 %v460_v19 }
   0xc   :  { %435 = vmatpush3.bf16.msra.mxu1 %v461_v20  ;;  %424 = vmatprep.subr.bf16.mxu0 %v472_v15 }
   0xd   :  { %436 = vmatprep.subr.bf16.mxu1 %v472_v15 }
   0xf   :  { %425 = vmatpush3.bf16.msra.mxu0 %v462_v21 }
  0x10   :  { %437 = vmatpush3.bf16.msra.mxu1 %v463_v22  ;;  %442 = vmatprep.subr.bf16.mxu0 %v472_v15 }
  0x90   :  { %v41_v4 = vpop.xlane.xlu0 %40 }
  0x91   :  { %v46_v5 = vmul.f32 0.015625, %v41_v4 }
  0x93   :  { %v48_v6 = vsub.f32 %v36_v0, %v46_v5 }
  0x94   :  { %v44_v7 = vpop.xlane.xlu0 %43 }
  0x95   :  { %v47_v8 = vmul.f32 0.015625, %v44_v7  ;;  %v50_v9 = vmul.f32 %v48_v6, %v48_v6 }
  0x97   :  { %v49_v10 = vsub.f32 %v37_v1, %v47_v8  ;;  %v52_v11 = vsel %vm38_vm0, %v50_v9, 0.0 }
  0x98   :  { %53 = vadd.xlane.f32.xlu1 %v52_v11 }
  0x99   :  { %v51_v12 = vmul.f32 %v49_v10, %v49_v10 }
  0x9b   :  { %v55_v13 = vsel %vm38_vm0, %v51_v12, 0.0 }
  0x9c   :  { %56 = vadd.xlane.f32.xlu1 %v55_v13 }
 0x125   :  { %v54_v23 = vpop.xlane.xlu1 %53 }
 0x126   :  { %v58_v24 = vmul.f32 0.015625, %v54_v23 }
 0x128   :  { %v60_v25 = vadd.f32 1e-05, %v58_v24 }
 0x129   :  { %v57_v26 = vpop.xlane.xlu1 %56 }
 0x12a   :  { %468 = vrsqrt.f32 %v60_v25  ;;  %v59_v27 = vmul.f32 0.015625, %v57_v26 }
 0x12c   :  { %v61_v28 = vadd.f32 1e-05, %v59_v27 }
 0x12e   :  { %470 = vrsqrt.f32 %v61_v28 }
 0x134   :  { %v469_v29 = vpop.eup %468 }
 0x135   :  { %v64_v30 = vmul.f32 %v469_v29, %v48_v6 }
 0x137   :  { %v73_v34 = vmul.f32 %v371_v31, %v64_v30 }
 0x138   :  { %v471_v32 = vpop.eup %470 }
 0x139   :  { %v65_v33 = vmul.f32 %v471_v32, %v49_v10  ;;  %v82_v37 = vadd.f32 %v372_v35, %v73_v34 }
 0x13b   :  { %v74_v36 = vmul.f32 %v371_v31, %v65_v33 }
 0x13d   :  { %v83_v38 = vadd.f32 %v372_v35, %v74_v36 }
 0x13f   :  { %v84_v40 = vpack.c.bf16 %v83_v38, %v82_v37 }
 0x141   :  { %427 = vmatmul.mubr.msk.bf16.vlgmr.msra.gmra.mrb[0].mxu0 %vm38_vm0, %v84_v40  ;;  %439 = vmatmul.mubr.msk.bf16.vlgmr.msra.gmra.mrb[0].mxu1 %vm38_vm0, %v84_v40 }
 0x142   :  { %443 = vmatpush3.bf16.msra.mxu0 %v464_v39  ;;  %450 = vmatprep.mubr.msk.bf16.mxu0 %vm473_vm1, %v472_v15 }
 0x143   :  { %444 = vmatprep.subr.bf16.mxu0 %v472_v15 }
 0x146   :  { %445 = vmatpush3.bf16.msra.mxu0 %v465_v41 }
 0x147   :  { %446 = vmatprep.subr.bf16.mxu0 %v472_v15 }
 0x14a   :  { %447 = vmatpush3.bf16.msra.mxu0 %v466_v42 }
 0x14b   :  { %448 = vmatprep.subr.bf16.mxu0 %v472_v15 }
 0x14e   :  { %449 = vmatpush3.bf16.msra.mxu0 %v467_v43 }
 0x151   :  { %451 = vmatmul.mubr.msk.bf16.vlgmr.msra.gmra.mrb[4].mxu0 %vm38_vm0, %v84_v40 }
 0x214   :  { %v161_v46 = vpop.f32.mrb[0].mxu0  ;;  %v252_v47 = vpop.f32.mrb[0].mxu1 }
 0x215   :  { %v162_v48 = vadd.f32 %v373_v44, %v161_v46  ;;  %v253_v49 = vadd.f32 %v381_v45, %v252_v47  ;;  %v428_v50 = vpop.f32.mrb[1].mxu0  ;;  %v440_v51 = vpop.f32.mrb[1].mxu1 }
 0x216   :  { %v164_v52 = vpop.f32.mrb[2].mxu0  ;;  %v255_v53 = vpop.f32.mrb[2].mxu1 }
 0x217   :  { %v397_v54 = vpack.c.bf16 %v162_v48, %v162_v48  ;;  %v399_v55 = vpack.c.bf16 %v253_v49, %v253_v49  ;;  %v165_v56 = vadd.f32 %v373_v44, %v164_v52  ;;  %v256_v57 = vadd.f32 %v381_v45, %v255_v53  ;;  %v429_v58 = vpop.f32.mrb[3].mxu0  ;;  %v441_v59 = vpop.f32.mrb[3].mxu1 }
 0x219   :  { %177 = vst.msk [vmem:[%s633_s9] sm:$0xf] %vm176_vm2, %v397_v54  ;;  %267 = vst.msk [vmem:[%s634_s10] sm:$0xf] %vm176_vm2, %v399_v55  ;;  %v398_v60 = vpack.c.bf16 %v165_v56, %v165_v56  ;;  %v400_v61 = vpack.c.bf16 %v256_v57, %v256_v57 }
 0x21b   :  { %178 = vst.msk [vmem:[%s633_s9 + $0x4] sm:$0xf] %vm176_vm2, %v398_v60  ;;  %268 = vst.msk [vmem:[%s634_s10 + $0x4] sm:$0xf] %vm176_vm2, %v400_v61 }
 0x224   :  { %v342_v63 = vpop.f32.mrb[4].mxu0 }
 0x225   :  { %v343_v0 = vadd.f32 %v389_v62, %v342_v63  ;;  %v452_v1 = vpop.f32.mrb[5].mxu0 }
 0x226   :  { %v345_v2 = vpop.f32.mrb[6].mxu0 }
 0x227   :  { %v401_v3 = vpack.c.bf16 %v343_v0, %v343_v0  ;;  %v346_v4 = vadd.f32 %v389_v62, %v345_v2  ;;  %v453_v5 = vpop.f32.mrb[7].mxu0 }
 0x229   :  { %357 = vst.msk [vmem:[%s636_s11] sm:$0xf] %vm176_vm2, %v401_v3  ;;  %v402_v6 = vpack.c.bf16 %v346_v4, %v346_v4 }
 0x22b   :  { %358 = vst.msk [vmem:[%s636_s11 + $0x4] sm:$0xf] %vm176_vm2, %v402_v6 }

// kernel: decoder_transformer_forward.23
= control target key start
LH: loop header
LB: loop body
LE: loop exit
PB: predicated region body
PF: predicated region fallthrough
CT: control target
= control target key end

     0   :  { %v150_v0 = vmov 0.0   ;;  %vm151_vm0 = vmmov 0   ;;  %vm64_vm1 = vcmask 523264   ;;  %s210_s1 = inlined_call_operand.vmem [shape: bf16[64,64], index: 1, kind: input, shape index: {}]   ;;  %s211_s0 = inlined_call_operand.vmem [shape: bf16[16,64], index: 0, kind: input, shape index: {}]   ;;  %s212_s2 = inlined_call_operand.vmem [shape: f32[1,64], index: 2, kind: input, shape index: {}]   ;;  %s213_s3 = inlined_call_operand.vmem [shape: f32[16,64], index: 3, kind: input, shape index: {}]   ;;  %s214_s4 = inlined_call_operand.vmem [shape: f32[16,64], index: 4, kind: output, shape index: {}]  }
   0x1   :  { %131 = vmatprep.subr.bf16.mxu0 %v150_v0  ;;  %v145_v1 = vld [vmem:[%s210_s1] sm:$0xff]   ;;  %139 = vmatprep.mubr.msk.bf16.mxu0 %vm151_vm0, %v150_v0  ;;  %v146_v2 = vld [vmem:[%s210_s1 + $0x8] sm:$0xff]   ;;  %v147_v3 = vld [vmem:[%s210_s1 + $0x10] sm:$0xff]  }
   0x2   :  { %132 = vmatpush3.bf16.msra.mxu0 %v145_v1  ;;  %v148_v4 = vld [vmem:[%s210_s1 + $0x18] sm:$0xff]   ;;  %v149_v5 = vld [vmem:[%s211_s0] sm:$0xff]   ;;  %v110_v12 = vld [vmem:[%s213_s3 + $0x8] sm:$0xff] }
   0x3   :  { %133 = vmatprep.subr.bf16.mxu0 %v150_v0  ;;  %v119_v6 = vld [vmem:[%s212_s2] ss:$0 sm:$0xff] }
   0x4   :  { %v109_v8 = vld [vmem:[%s213_s3] sm:$0xff] }
   0x6   :  { %134 = vmatpush3.bf16.msra.mxu0 %v146_v2 }
   0x7   :  { %135 = vmatprep.subr.bf16.mxu0 %v150_v0 }
   0xa   :  { %136 = vmatpush3.bf16.msra.mxu0 %v147_v3 }
   0xb   :  { %137 = vmatprep.subr.bf16.mxu0 %v150_v0 }
   0xe   :  { %138 = vmatpush3.bf16.msra.mxu0 %v148_v4 }
  0x11   :  { %140 = vmatmul.mubr.msk.bf16.vlgmr.msra.gmra.mrb[0].mxu0 %vm64_vm1, %v149_v5 }
  0xe4   :  { %v102_v7 = vpop.f32.mrb[0].mxu0 }
  0xe5   :  { %v103_v9 = vadd.f32 %v119_v6, %v102_v7  ;;  %v141_v10 = vpop.f32.mrb[1].mxu0 }
  0xe6   :  { %v105_v11 = vpop.f32.mrb[2].mxu0 }
  0xe7   :  { %v111_v13 = vadd.f32 %v109_v8, %v103_v9  ;;  %v106_v14 = vadd.f32 %v119_v6, %v105_v11  ;;  %v142_v15 = vpop.f32.mrb[3].mxu0 }
  0xe9   :  { %113 = vst.msk [vmem:[%s214_s4] sm:$0xff] %vm64_vm1, %v111_v13  ;;  %v112_v16 = vadd.f32 %v110_v12, %v106_v14 }
  0xeb   :  { %114 = vst.msk [vmem:[%s214_s4 + $0x8] sm:$0xff] %vm64_vm1, %v112_v16 }

// kernel: decoder_transformer_forward.24
= control target key start
LH: loop header
LB: loop body
LE: loop exit
PB: predicated region body
PF: predicated region fallthrough
CT: control target
= control target key end

     0   :  { %vm23_vm0 = vcmask 523264   ;;  %v207_v15 = vmov 0.0   ;;  %vm208_vm1 = vmmov 0   ;;  %vm161_vm2 = vcmask 519168   ;;  %s277_s0 = inlined_call_operand.vmem [shape: f32[16,64], index: 0, kind: input, shape index: {}]   ;;  %s278_s3 = inlined_call_operand.vmem [shape: bf16[64,64], index: 3, kind: input, shape index: {}]   ;;  %s279_s1 = inlined_call_operand.vmem [shape: f32[1,64], index: 1, kind: input, shape index: {}]   ;;  %s280_s2 = inlined_call_operand.vmem [shape: f32[1,64], index: 2, kind: input, shape index: {}]   ;;  %s281_s4 = inlined_call_operand.vmem [shape: f32[1,64], index: 4, kind: input, shape index: {}]   ;;  %s282_s5 = inlined_call_operand.vmem [shape: bf16[16,64], index: 5, kind: output, shape index: {}]  }
   0x1   :  { %v21_v0 = vld [vmem:[%s277_s0] sm:$0xff]  ;;  %v22_v1 = vld [vmem:[%s277_s0 + $0x8] sm:$0xff]  ;;  %185 = vmatprep.subr.bf16.mxu0 %v207_v15  ;;  %v201_v17 = vld [vmem:[%s278_s3 + $0x10] sm:$0xff]   ;;  %193 = vmatprep.mubr.msk.bf16.mxu0 %vm208_vm1, %v207_v15 }
   0x2   :  { %v24_v2 = vsel %vm23_vm0, %v21_v0, 0.0  ;;  %v27_v3 = vsel %vm23_vm0, %v22_v1, 0.0  ;;  %v199_v14 = vld [vmem:[%s278_s3] sm:$0xff]   ;;  %v200_v16 = vld [vmem:[%s278_s3 + $0x8] sm:$0xff]   ;;  %v202_v18 = vld [vmem:[%s278_s3 + $0x18] sm:$0xff]  }
   0x3   :  { %25 = vadd.xlane.f32.xlu0 %v24_v2  ;;  %186 = vmatpush3.bf16.msra.mxu0 %v199_v14  ;;  %v168_v27 = vld [vmem:[%s279_s1] ss:$0 sm:$0xff] }
   0x4   :  { %187 = vmatprep.subr.bf16.mxu0 %v207_v15  ;;  %v169_v31 = vld [vmem:[%s280_s2] ss:$0 sm:$0xff] }
   0x5   :  { %v170_v36 = vld [vmem:[%s281_s4] ss:$0 sm:$0xff] }
   0x7   :  { %28 = vadd.xlane.f32.xlu0 %v27_v3  ;;  %188 = vmatpush3.bf16.msra.mxu0 %v200_v16 }
   0x8   :  { %189 = vmatprep.subr.bf16.mxu0 %v207_v15 }
   0xb   :  { %190 = vmatpush3.bf16.msra.mxu0 %v201_v17 }
   0xc   :  { %191 = vmatprep.subr.bf16.mxu0 %v207_v15 }
   0xf   :  { %192 = vmatpush3.bf16.msra.mxu0 %v202_v18 }
  0x90   :  { %v26_v4 = vpop.xlane.xlu0 %25 }
  0x91   :  { %v31_v5 = vmul.f32 0.015625, %v26_v4 }
  0x93   :  { %v33_v6 = vsub.f32 %v21_v0, %v31_v5 }
  0x94   :  { %v29_v7 = vpop.xlane.xlu0 %28 }
  0x95   :  { %v32_v8 = vmul.f32 0.015625, %v29_v7  ;;  %v35_v9 = vmul.f32 %v33_v6, %v33_v6 }
  0x97   :  { %v34_v10 = vsub.f32 %v22_v1, %v32_v8  ;;  %v37_v11 = vsel %vm23_vm0, %v35_v9, 0.0 }
  0x98   :  { %38 = vadd.xlane.f32.xlu1 %v37_v11 }
  0x99   :  { %v36_v12 = vmul.f32 %v34_v10, %v34_v10 }
  0x9b   :  { %v40_v13 = vsel %vm23_vm0, %v36_v12, 0.0 }
  0x9c   :  { %41 = vadd.xlane.f32.xlu1 %v40_v13 }
 0x125   :  { %v39_v19 = vpop.xlane.xlu1 %38 }
 0x126   :  { %v43_v20 = vmul.f32 0.015625, %v39_v19 }
 0x128   :  { %v45_v21 = vadd.f32 1e-05, %v43_v20 }
 0x129   :  { %v42_v22 = vpop.xlane.xlu1 %41 }
 0x12a   :  { %203 = vrsqrt.f32 %v45_v21  ;;  %v44_v23 = vmul.f32 0.015625, %v42_v22 }
 0x12c   :  { %v46_v24 = vadd.f32 1e-05, %v44_v23 }
 0x12e   :  { %205 = vrsqrt.f32 %v46_v24 }
 0x134   :  { %v204_v25 = vpop.eup %203 }
 0x135   :  { %v49_v26 = vmul.f32 %v204_v25, %v33_v6 }
 0x137   :  { %v58_v30 = vmul.f32 %v168_v27, %v49_v26 }
 0x138   :  { %v206_v28 = vpop.eup %205 }
 0x139   :  { %v50_v29 = vmul.f32 %v206_v28, %v34_v10  ;;  %v67_v33 = vadd.f32 %v169_v31, %v58_v30 }
 0x13b   :  { %v59_v32 = vmul.f32 %v168_v27, %v50_v29 }
 0x13d   :  { %v68_v34 = vadd.f32 %v169_v31, %v59_v32 }
 0x13f   :  { %v69_v35 = vpack.c.bf16 %v68_v34, %v67_v33 }
 0x141   :  { %194 = vmatmul.mubr.msk.bf16.vlgmr.msra.gmra.mrb[0].mxu0 %vm23_vm0, %v69_v35 }
 0x214   :  { %v146_v37 = vpop.f32.mrb[0].mxu0 }
 0x215   :  { %v147_v38 = vadd.f32 %v170_v36, %v146_v37  ;;  %v195_v39 = vpop.f32.mrb[1].mxu0 }
 0x216   :  { %v149_v40 = vpop.f32.mrb[2].mxu0 }
 0x217   :  { %v178_v41 = vpack.c.bf16 %v147_v38, %v147_v38  ;;  %v150_v42 = vadd.f32 %v170_v36, %v149_v40  ;;  %v196_v43 = vpop.f32.mrb[3].mxu0 }
 0x219   :  { %162 = vst.msk [vmem:[%s282_s5] sm:$0xf] %vm161_vm2, %v178_v41  ;;  %v179_v44 = vpack.c.bf16 %v150_v42, %v150_v42 }
 0x21b   :  { %163 = vst.msk [vmem:[%s282_s5 + $0x4] sm:$0xf] %vm161_vm2, %v179_v44 }

// kernel: decoder_transformer_forward.22
= control target key start
LH: loop header
LB: loop body
LE: loop exit
PB: predicated region body
PF: predicated region fallthrough
CT: control target
= control target key end

     0   :  { %s889_s12 = smov 0   ;;  %s970_s0 = inlined_call_operand.vmem [shape: bf16[2,4,8,16], index: 0, kind: input, shape index: {}]   ;;  %s971_s1 = inlined_call_operand.vmem [shape: bf16[2,4,8,16], index: 1, kind: input, shape index: {}]   ;;  %s972_s2 = inlined_call_operand.vmem [shape: bf16[2,4,8,16], index: 2, kind: input, shape index: {}]   ;;  %s973_s3 = inlined_call_operand.vmem [shape: bf16[2,4,8,16], index: 3, kind: output, shape index: {}]  }
   0x1 LB: > { %s742_s13 = sadd.s32 4294967295, %s865_s12   ;;  %p746_p0 = scmp.ge.s32.totalorder %s865_s12, 1  ;;  %s865_s12 = sphi %s889_s12, %s13_s12  }
   0x2   : > { %p157_p1 = scmp.lt.s32.totalorder %s865_s12, 3 }
   0x4   : > { %p158_p2 = pnand %p746_p0, %p157_p1 }
   0x5   : > { %p191_p3 = scmp.lt.s32.totalorder (!%p158_p2), %s742_s13, 1  ;;  %v867_v0 = vmov (!%p158_p2), 0.0   ;;  %vm868_vm0 = vmmov (!%p158_p2), 0   ;;  %vm224_vm1 = vcmask (!%p158_p2), 130048   ;;  %v409_v13 = vlaneseq (!%p158_p2) }
   0x6   : > { %161 = sbr.rel (%p158_p2) target bundleno = 781 (0x30d), region = 32  ;;  %785 = vmatprep.subr.bf16.mxu0 (!%p158_p2), %v867_v0  ;;  %791 = vmatprep.subr.bf16.mxu1 (!%p158_p2), %v867_v0  ;;  %vm420_vm3 = vcmask (!%p158_p2), 64512   ;;  %vm472_vm4 = vcmask (!%p158_p2), 1043456   ;;  %vm658_vm5 = vcmask (!%p158_p2), 125952  }
   0x7   : > { %787 = vmatprep.mubr.msk.bf16.mxu0 (!%p158_p2), %vm868_vm0, %v867_v0  ;;  %793 = vmatprep.mubr.msk.bf16.mxu1 (!%p158_p2), %vm868_vm0, %v867_v0  ;;  %v410_v14 = vshrl.u32 (!%p158_p2), %v409_v13, 7  ;;  %v412_v15 = vand.u32 (!%p158_p2), 127, %v409_v13 }
   0x9   : > { %vm413_vm2 = vcmp.gt.s32.totalorder (!%p158_p2), %v412_v15, %v410_v14 }
   0xd   : > { %s975_s13 = smov (!%p191_p3, %s742_s13), 1 }
   0xe   : > { %s903_s14 = sshll.u32 %s975_s13, 4 }
   0xf   : > { %s200_s17 = scalar_lea.vmem %s971_s1, %s903_s14  ;;  %s195_s20 = scalar_lea.vmem %s970_s0, %s903_s14 }
  0x10   : > { %v216_v1 = vld [vmem:[%s200_s17] sm:$0xf]  ;;  %v217_v2 = vld [vmem:[%s200_s17 + $0x4] sm:$0xf]  ;;  %v218_v5 = vld [vmem:[%s200_s17 + $0x8] sm:$0xf]  ;;  %s205_s23 = scalar_lea.vmem %s972_s2, %s903_s14  ;;  %s210_s26 = scalar_lea.vmem %s973_s3, %s903_s14 }
  0x11   : > { %v229_v3 = vsel %vm224_vm1, %v216_v1, 0  ;;  %v275_v4 = vsel %vm224_vm1, %v217_v2, 0  ;;  %v219_v6 = vld [vmem:[%s200_s17 + $0xc] sm:$0xf]  ;;  %v212_v7 = vld [vmem:[%s195_s20] sm:$0xf] }
  0x12   : > { %786 = vmatpush3.bf16.xpose.msra.mxu0 %v229_v3  ;;  %792 = vmatpush3.bf16.xpose.msra.mxu1 %v275_v4  ;;  %v213_v8 = vld [vmem:[%s195_s20 + $0x4] sm:$0xf]  ;;  %v321_v9 = vsel %vm224_vm1, %v218_v5, 0  ;;  %v367_v10 = vsel %vm224_vm1, %v219_v6, 0  ;;  %v214_v11 = vld [vmem:[%s195_s20 + $0x8] sm:$0xf] }
  0x13   : > { %797 = vmatprep.subr.bf16.mxu0 %v867_v0  ;;  %803 = vmatprep.subr.bf16.mxu1 %v867_v0  ;;  %v215_v12 = vld [vmem:[%s195_s20 + $0xc] sm:$0xf]  ;;  %v220_v60 = vld [vmem:[%s205_s23] sm:$0xf]  ;;  %v221_v62 = vld [vmem:[%s205_s23 + $0x4] sm:$0xf] }
  0x14   : > { %v474_v61 = vsel %vm472_vm4, %v220_v60, 0  ;;  %v520_v63 = vsel %vm472_vm4, %v221_v62, 0  ;;  %v222_v1 = vld [vmem:[%s205_s23 + $0x8] sm:$0xf]  ;;  %v223_v3 = vld [vmem:[%s205_s23 + $0xc] sm:$0xf] }
  0x15   : > { %v566_v2 = vsel %vm472_vm4, %v222_v1, 0  ;;  %v612_v4 = vsel %vm472_vm4, %v223_v3, 0 }
  0x19   : > { %788 = vmatmul.mubr.msk.bf16.vlgmr.msra.gmra.mrb[0].mxu0 %vm224_vm1, %v212_v7  ;;  %794 = vmatmul.mubr.msk.bf16.vlgmr.msra.gmra.mrb[0].mxu1 %vm224_vm1, %v213_v8 }
  0x1a   : > { %798 = vmatpush3.bf16.xpose.msra.mxu0 %v321_v9  ;;  %804 = vmatpush3.bf16.xpose.msra.mxu1 %v367_v10 }
  0x1b   : > { %799 = vmatprep.mubr.msk.bf16.mxu0 %vm868_vm0, %v867_v0  ;;  %805 = vmatprep.mubr.msk.bf16.mxu1 %vm868_vm0, %v867_v0 }
  0x1c   : > { %809 = vmatprep.subr.bf16.mxu0 %v867_v0  ;;  %815 = vmatprep.subr.bf16.mxu1 %v867_v0 }
  0x21   : > { %800 = vmatmul.mubr.msk.bf16.vlgmr.msra.gmra.mrb[4].mxu0 %vm224_vm1, %v214_v11  ;;  %806 = vmatmul.mubr.msk.bf16.vlgmr.msra.gmra.mrb[4].mxu1 %vm224_vm1, %v215_v12 }
  0x22   : > { %811 = vmatprep.mubr.msk.bf16.mxu0 %vm868_vm0, %v867_v0  ;;  %817 = vmatprep.mubr.msk.bf16.mxu1 %vm868_vm0, %v867_v0 }
  0x23   : > { %810 = vmatpush3.bf16.msra.mxu0 %v474_v61  ;;  %816 = vmatpush3.bf16.msra.mxu1 %v520_v63 }
  0x24   : > { %821 = vmatprep.subr.bf16.mxu0 %v867_v0  ;;  %827 = vmatprep.subr.bf16.mxu1 %v867_v0 }
  0xec   : > { %v265_v16 = vpop.f32.mrb[0].mxu0  ;;  %v311_v17 = vpop.f32.mrb[0].mxu1 }
  0xed   : > { %v416_v18 = vsel %vm413_vm2, -inf, %v265_v16  ;;  %v789_v19 = vpop.f32.mrb[1].mxu0  ;;  %v417_v20 = vsel %vm413_vm2, -inf, %v311_v17  ;;  %v795_v21 = vpop.f32.mrb[1].mxu1 }
  0xee   : > { %v268_v22 = vpop.f32.mrb[2].mxu0  ;;  %v421_v23 = vsel %vm420_vm3, %v416_v18, -inf  ;;  %v314_v24 = vpop.f32.mrb[2].mxu1  ;;  %v424_v27 = vsel %vm420_vm3, %v417_v20, -inf }
  0xef   : > { %422 = vmax.xlane.f32.xlu0 %v421_v23  ;;  %v790_v25 = vpop.f32.mrb[3].mxu0  ;;  %v796_v26 = vpop.f32.mrb[3].mxu1 }
  0xf3   : > { %425 = vmax.xlane.f32.xlu0 %v424_v27 }
  0xf4   : > { %v357_v28 = vpop.f32.mrb[4].mxu0  ;;  %v403_v29 = vpop.f32.mrb[4].mxu1 }
  0xf5   : > { %v418_v30 = vsel %vm413_vm2, -inf, %v357_v28  ;;  %v801_v31 = vpop.f32.mrb[5].mxu0  ;;  %v419_v32 = vsel %vm413_vm2, -inf, %v403_v29  ;;  %v807_v33 = vpop.f32.mrb[5].mxu1 }
  0xf6   : > { %v360_v34 = vpop.f32.mrb[6].mxu0  ;;  %v427_v35 = vsel %vm420_vm3, %v418_v30, -inf  ;;  %v406_v36 = vpop.f32.mrb[6].mxu1  ;;  %v430_v39 = vsel %vm420_vm3, %v419_v32, -inf }
  0xf7   : > { %428 = vmax.xlane.f32.xlu1 %v427_v35  ;;  %v802_v37 = vpop.f32.mrb[7].mxu0  ;;  %v808_v38 = vpop.f32.mrb[7].mxu1 }
  0xfb   : > { %431 = vmax.xlane.f32.xlu1 %v430_v39 }
 0x17c   : > { %v423_v40 = vpop.xlane.xlu0 %422 }
 0x17d   : > { %v433_v41 = vsub.f32 %v416_v18, %v423_v40 }
 0x17f   : > { %v437_v42 = vmul.f32 1.442695, %v433_v41 }
 0x180   : > { %v426_v43 = vpop.xlane.xlu0 %425 }
 0x181   : > { %843 = vpow2.f32 %v437_v42  ;;  %v434_v44 = vsub.f32 %v417_v20, %v426_v43 }
 0x183   : > { %v439_v45 = vmul.f32 1.442695, %v434_v44 }
 0x184   : > { %v429_v46 = vpop.xlane.xlu1 %428 }
 0x185   : > { %845 = vpow2.f32 %v439_v45  ;;  %v435_v47 = vsub.f32 %v418_v30, %v429_v46 }
 0x187   : > { %v441_v48 = vmul.f32 1.442695, %v435_v47 }
 0x188   : > { %v432_v49 = vpop.xlane.xlu1 %431 }
 0x189   : > { %847 = vpow2.f32 %v441_v48  ;;  %v436_v50 = vsub.f32 %v419_v32, %v432_v49 }
 0x18b   : > { %v844_v51 = vpop.eup %843  ;;  %v443_v52 = vmul.f32 1.442695, %v436_v50 }
 0x18c   : > { %v445_v53 = vsel %vm420_vm3, %v844_v51, 0.0 }
 0x18d   : > { %849 = vpow2.f32 %v443_v52  ;;  %446 = vadd.xlane.f32.xlu0 %v445_v53 }
 0x18f   : > { %v846_v54 = vpop.eup %845 }
 0x190   : > { %v448_v55 = vsel %vm420_vm3, %v846_v54, 0.0 }
 0x191   : > { %449 = vadd.xlane.f32.xlu1 %v448_v55 }
 0x193   : > { %v848_v56 = vpop.eup %847 }
 0x194   : > { %v451_v57 = vsel %vm420_vm3, %v848_v56, 0.0 }
 0x195   : > { %452 = vadd.xlane.f32.xlu0 %v451_v57 }
 0x197   : > { %v850_v58 = vpop.eup %849 }
 0x198   : > { %v454_v59 = vsel %vm420_vm3, %v850_v58, 0.0 }
 0x199   : > { %455 = vadd.xlane.f32.xlu1 %v454_v59 }
 0x21a   : > { %v447_v5 = vpop.xlane.xlu0 %446 }
 0x21b   : > { %851 = vrcp.f32 %v447_v5 }
 0x21e   : > { %v450_v6 = vpop.xlane.xlu1 %449 }
 0x21f   : > { %853 = vrcp.f32 %v450_v6 }
 0x222   : > { %v453_v7 = vpop.xlane.xlu0 %452 }
 0x223   : > { %855 = vrcp.f32 %v453_v7 }
 0x225   : > { %v852_v8 = vpop.eup %851 }
 0x226   : > { %v461_v9 = vmul.f32 %v852_v8, %v844_v51  ;;  %v456_v10 = vpop.xlane.xlu1 %455 }
 0x227   : > { %857 = vrcp.f32 %v456_v10 }
 0x228   : > { %v465_v11 = vpack.c.bf16 %v461_v9, %v461_v9 }
 0x229   : > { %v854_v12 = vpop.eup %853 }
 0x22a   : > { %v462_v13 = vmul.f32 %v854_v12, %v846_v54  ;;  %812 = vmatmul.mubr.msk.bf16.vlgmr.msra.gmra.mrb[8].mxu0 %vm420_vm3, %v465_v11 }
 0x22b   : > { %822 = vmatpush3.bf16.msra.mxu0 %v566_v2  ;;  %823 = vmatprep.mubr.msk.bf16.mxu0 %vm868_vm0, %v867_v0 }
 0x22c   : > { %v466_v14 = vpack.c.bf16 %v462_v13, %v462_v13 }
 0x22d   : > { %v856_v15 = vpop.eup %855 }
 0x22e   : > { %v463_v16 = vmul.f32 %v856_v15, %v848_v56  ;;  %818 = vmatmul.mubr.msk.bf16.vlgmr.msra.gmra.mrb[8].mxu1 %vm420_vm3, %v466_v14 }
 0x22f   : > { %828 = vmatpush3.bf16.msra.mxu1 %v612_v4  ;;  %829 = vmatprep.mubr.msk.bf16.mxu1 %vm868_vm0, %v867_v0 }
 0x230   : > { %v467_v17 = vpack.c.bf16 %v463_v16, %v463_v16 }
 0x231   : > { %v858_v18 = vpop.eup %857 }
 0x232   : > { %v464_v19 = vmul.f32 %v858_v18, %v850_v58  ;;  %824 = vmatmul.mubr.msk.bf16.vlgmr.msra.gmra.mrb[12].mxu0 %vm420_vm3, %v467_v17 }
 0x234   : > { %v468_v20 = vpack.c.bf16 %v464_v19, %v464_v19 }
 0x236   : > { %830 = vmatmul.mubr.msk.bf16.vlgmr.msra.gmra.mrb[12].mxu1 %vm420_vm3, %v468_v20 }
 0x2fd   : > { %v510_v21 = vpop.f32.mrb[8].mxu0 }
 0x2fe   : > { %v654_v22 = vpack.c.bf16 %v510_v21, %v510_v21  ;;  %v813_v23 = vpop.f32.mrb[9].mxu0 }
 0x2ff   : > { %v513_v24 = vpop.f32.mrb[10].mxu0 }
 0x300   : > { %659 = vst.msk [vmem:[%s210_s26] sm:$0xf] %vm658_vm5, %v654_v22  ;;  %v814_v0 = vpop.f32.mrb[11].mxu0 }
 0x301   : > { %v556_v25 = vpop.f32.mrb[8].mxu1 }
 0x302   : > { %v655_v26 = vpack.c.bf16 %v556_v25, %v556_v25  ;;  %v819_v27 = vpop.f32.mrb[9].mxu1 }
 0x303   : > { %v559_v28 = vpop.f32.mrb[10].mxu1 }
 0x304   : > { %660 = vst.msk [vmem:[%s210_s26 + $0x4] sm:$0xf] %vm658_vm5, %v655_v26  ;;  %v820_v29 = vpop.f32.mrb[11].mxu1 }
 0x305   : > { %v602_v30 = vpop.f32.mrb[12].mxu0 }
 0x306   : > { %v656_v31 = vpack.c.bf16 %v602_v30, %v602_v30  ;;  %v825_v32 = vpop.f32.mrb[13].mxu0 }
 0x307   : > { %v605_v33 = vpop.f32.mrb[14].mxu0 }
 0x308   : > { %661 = vst.msk [vmem:[%s210_s26 + $0x8] sm:$0xf] %vm658_vm5, %v656_v31  ;;  %v826_v34 = vpop.f32.mrb[15].mxu0 }
 0x309   : > { %v648_v35 = vpop.f32.mrb[12].mxu1 }
 0x30a   : > { %v657_v36 = vpack.c.bf16 %v648_v35, %v648_v35  ;;  %v831_v37 = vpop.f32.mrb[13].mxu1 }
 0x30b   : > { %v651_v38 = vpop.f32.mrb[14].mxu1 }
 0x30c   : > { %662 = vst.msk [vmem:[%s210_s26 + $0xc] sm:$0xf] %vm658_vm5, %v657_v36  ;;  %v832_v39 = vpop.f32.mrb[15].mxu1 }
 0x30d PF: > { %s13_s12 = sadd.s32 1, %s865_s12  }
 0x30e   : > { %p10_p4 = scmp.ge.s32.totalorder %s13_s12, 4  }
 0x310   :  { %12 = sbr.rel (!%p10_p4) target bundleno = 1 (0x1), region = 68 }

// kernel: decoder_transformer_forward.20
= control target key start
LH: loop header
LB: loop body
LE: loop exit
PB: predicated region body
PF: predicated region fallthrough
CT: control target
= control target key end

     0   :  { %v201_v1 = vmov 0   ;;  %vm102_vm0 = vcmask 523264   ;;  %v21_v10 = vlaneseq  ;;  %s258_s1 = inlined_call_operand.vmem [shape: bf16[64,256], index: 1, kind: input, shape index: {}]   ;;  %s259_s0 = inlined_call_operand.vmem [shape: bf16[16,64], index: 0, kind: input, shape index: {}]   ;;  %s260_s2 = inlined_call_operand.vmem [shape: f32[1,256], index: 2, kind: input, shape index: {}]   ;;  %s261_s3 = inlined_call_operand.vmem [shape: bf16[16,256], index: 3, kind: output, shape index: {}]  }
   0x1   :  { %v188_v0 = vld [vmem:[%s258_s1 + $0x4] ss:$8 sps:$4 sm:$0xff]   ;;  %138 = vmatprep.mubr.bf16.mxu0 %v201_v1  ;;  %v190_v2 = vld [vmem:[%s258_s1] ss:$8 sps:$4 sm:$0xff]   ;;  %v191_v3 = vld [vmem:[%s258_s1 + $0x14] ss:$8 sps:$4 sm:$0xff]  }
   0x2   :  { %106 = vmatprep.subr.bf16.mxu0 %v188_v0  ;;  %v193_v4 = vld [vmem:[%s258_s1 + $0x10] ss:$8 sps:$4 sm:$0xff]   ;;  %v194_v5 = vld [vmem:[%s258_s1 + $0x24] ss:$8 sps:$4 sm:$0xff]   ;;  %v196_v6 = vld [vmem:[%s258_s1 + $0x20] ss:$8 sps:$4 sm:$0xff]  }
   0x3   :  { %107 = vmatpush1.bf16.msra.mxu0 %v190_v2  ;;  %v197_v7 = vld [vmem:[%s258_s1 + $0x34] ss:$8 sps:$4 sm:$0xff]   ;;  %v199_v8 = vld [vmem:[%s258_s1 + $0x30] ss:$8 sps:$4 sm:$0xff]   ;;  %v200_v9 = vld [vmem:[%s259_s0] sm:$0xff]   ;;  %v22_v11 = vshrl.u32 %v21_v10, 7 }
   0x4   :  { %108 = vmatprep.subr.bf16.mxu0 %v191_v3  ;;  %v19_v14 = vld [vmem:[%s260_s2] sm:$0x3] }
   0x5   :  { %v23_v12 = vsub.s32 0, %v22_v11  ;;  %v27_v13 = vsub.s32 1, %v22_v11 }
   0x7   :  { %109 = vmatpush1.bf16.msra.mxu0 %v193_v4  ;;  %v24_v15 = vrot.slane %v19_v14, %v23_v12  ;;  %v28_v16 = vrot.slane %v19_v14, %v27_v13 }
   0x8   :  { %110 = vmatprep.subr.bf16.mxu0 %v194_v5 }
   0x9   :  { %v184_v17 = vpack.c.bf16 %v28_v16, %v24_v15 }
   0xb   :  { %111 = vmatpush1.bf16.msra.mxu0 %v196_v6  ;;  %v43_v18 = vunpack.c.l.bf16 %v184_v17  ;;  %v44_v19 = vunpack.c.h.bf16 %v184_v17 }
   0xc   :  { %112 = vmatprep.subr.bf16.mxu0 %v197_v7 }
   0xf   :  { %113 = vmatpush1.bf16.msra.mxu0 %v199_v8 }
  0x12   :  { %181 = vmatmul.mubr.msk.bf16.vlgmr.msra.gmra.mrb[0].mxu0 %vm102_vm0, %v200_v9 }
  0xe5   :  { %v140_v20 = vpop.f32.mrb[0].mxu0 }
  0xe6   :  { %v149_v21 = vadd.f32 %v140_v20, %v43_v18  ;;  %v142_v22 = vpop.f32.mrb[1].mxu0 }
  0xe7   :  { %v150_v23 = vadd.f32 %v142_v22, %v44_v19  ;;  %v144_v24 = vpop.f32.mrb[2].mxu0 }
  0xe8   :  { %v151_v25 = vadd.f32 %v144_v24, %v43_v18  ;;  %v146_v26 = vpop.f32.mrb[3].mxu0 }
  0xe9   :  { %v185_v27 = vpack.c.bf16 %v150_v23, %v149_v21  ;;  %v152_v28 = vadd.f32 %v146_v26, %v44_v19 }
  0xeb   :  { %165 = vst [vmem:[%s261_s3] sm:$0xff] %v185_v27  ;;  %v186_v29 = vpack.c.bf16 %v152_v28, %v151_v25 }
  0xed   :  { %166 = vst [vmem:[%s261_s3 + $0x8] sm:$0xff] %v186_v29 }

// kernel: decoder_transformer_forward.19
= control target key start
LH: loop header
LB: loop body
LE: loop exit
PB: predicated region body
PF: predicated region fallthrough
CT: control target
= control target key end

     0   :  { %vm16_vm0 = vcmask 523264   ;;  %s118_s0 = inlined_call_operand.vmem [shape: f32[16,64], index: 0, kind: input, shape index: {}]   ;;  %s119_s1 = inlined_call_operand.vmem [shape: f32[1,64], index: 1, kind: input, shape index: {}]   ;;  %s120_s2 = inlined_call_operand.vmem [shape: f32[1,64], index: 2, kind: input, shape index: {}]   ;;  %s121_s3 = inlined_call_operand.vmem [shape: f32[16,64], index: 3, kind: output, shape index: {}]  }
   0x1   :  { %v14_v0 = vld [vmem:[%s118_s0] sm:$0xff]  ;;  %v15_v1 = vld [vmem:[%s118_s0 + $0x8] sm:$0xff] }
   0x2   :  { %v17_v2 = vsel %vm16_vm0, %v14_v0, 0.0  ;;  %v20_v3 = vsel %vm16_vm0, %v15_v1, 0.0  ;;  %v68_v21 = vld [vmem:[%s119_s1] ss:$0 sm:$0xff] }
   0x3   :  { %18 = vadd.xlane.f32.xlu0 %v17_v2  ;;  %v69_v23 = vld [vmem:[%s120_s2] ss:$0 sm:$0xff] }
   0x7   :  { %21 = vadd.xlane.f32.xlu0 %v20_v3 }
  0x90   :  { %v19_v4 = vpop.xlane.xlu0 %18 }
  0x91   :  { %v24_v5 = vmul.f32 0.015625, %v19_v4 }
  0x93   :  { %v26_v6 = vsub.f32 %v14_v0, %v24_v5 }
  0x94   :  { %v22_v7 = vpop.xlane.xlu0 %21 }
  0x95   :  { %v25_v8 = vmul.f32 0.015625, %v22_v7  ;;  %v28_v9 = vmul.f32 %v26_v6, %v26_v6 }
  0x97   :  { %v27_v10 = vsub.f32 %v15_v1, %v25_v8  ;;  %v30_v11 = vsel %vm16_vm0, %v28_v9, 0.0 }
  0x98   :  { %31 = vadd.xlane.f32.xlu1 %v30_v11 }
  0x99   :  { %v29_v12 = vmul.f32 %v27_v10, %v27_v10 }
  0x9b   :  { %v33_v13 = vsel %vm16_vm0, %v29_v12, 0.0 }
  0x9c   :  { %34 = vadd.xlane.f32.xlu1 %v33_v13 }
 0x125   :  { %v32_v14 = vpop.xlane.xlu1 %31 }
 0x126   :  { %v36_v15 = vmul.f32 0.015625, %v32_v14 }
 0x128   :  { %v38_v16 = vadd.f32 1e-05, %v36_v15 }
 0x129   :  { %v35_v17 = vpop.xlane.xlu1 %34 }
 0x12a   :  { %70 = vrsqrt.f32 %v38_v16  ;;  %v37_v18 = vmul.f32 0.015625, %v35_v17 }
 0x12c   :  { %v39_v19 = vadd.f32 1e-05, %v37_v18 }
 0x12e   :  { %72 = vrsqrt.f32 %v39_v19 }
 0x134   :  { %v71_v20 = vpop.eup %70 }
 0x135   :  { %v42_v22 = vmul.f32 %v71_v20, %v26_v6 }
 0x137   :  { %v51_v24 = vmul.f32 %v68_v21, %v42_v22 }
 0x138   :  { %v73_v25 = vpop.eup %72 }
 0x139   :  { %v60_v26 = vadd.f32 %v69_v23, %v51_v24  ;;  %v43_v27 = vmul.f32 %v73_v25, %v27_v10 }
 0x13b   :  { %62 = vst.msk [vmem:[%s121_s3] sm:$0xff] %vm16_vm0, %v60_v26  ;;  %v52_v28 = vmul.f32 %v68_v21, %v43_v27 }
 0x13d   :  { %v61_v29 = vadd.f32 %v69_v23, %v52_v28 }
 0x13f   :  { %63 = vst.msk [vmem:[%s121_s3 + $0x8] sm:$0xff] %vm16_vm0, %v61_v29 }

// kernel: decoder_transformer_forward.27
= control target key start
LH: loop header
LB: loop body
LE: loop exit
PB: predicated region body
PF: predicated region fallthrough
CT: control target
= control target key end

     0   :  { %vm23_vm0 = vcmask 523264   ;;  %v209_v15 = vmov 0.0   ;;  %vm210_vm1 = vmmov 0   ;;  %vm163_vm2 = vcmask 519168   ;;  %s279_s0 = inlined_call_operand.vmem [shape: f32[16,64], index: 0, kind: input, shape index: {}]   ;;  %s280_s3 = inlined_call_operand.vmem [shape: bf16[64,64], index: 3, kind: input, shape index: {}]   ;;  %s281_s1 = inlined_call_operand.vmem [shape: f32[1,64], index: 1, kind: input, shape index: {}]   ;;  %s282_s2 = inlined_call_operand.vmem [shape: f32[1,64], index: 2, kind: input, shape index: {}]   ;;  %s283_s4 = inlined_call_operand.vmem [shape: f32[1,64], index: 4, kind: input, shape index: {}]   ;;  %s284_s5 = inlined_call_operand.vmem [shape: bf16[16,64], index: 5, kind: output, shape index: {}]  }
   0x1   :  { %v21_v0 = vld [vmem:[%s279_s0] sm:$0xff]  ;;  %v22_v1 = vld [vmem:[%s279_s0 + $0x8] sm:$0xff]  ;;  %187 = vmatprep.subr.bf16.mxu0 %v209_v15  ;;  %v203_v17 = vld [vmem:[%s280_s3 + $0x10] sm:$0xff]   ;;  %195 = vmatprep.mubr.msk.bf16.mxu0 %vm210_vm1, %v209_v15 }
   0x2   :  { %v24_v2 = vsel %vm23_vm0, %v21_v0, 0.0  ;;  %v27_v3 = vsel %vm23_vm0, %v22_v1, 0.0  ;;  %v201_v14 = vld [vmem:[%s280_s3] sm:$0xff]   ;;  %v202_v16 = vld [vmem:[%s280_s3 + $0x8] sm:$0xff]   ;;  %v204_v18 = vld [vmem:[%s280_s3 + $0x18] sm:$0xff]  }
   0x3   :  { %25 = vadd.xlane.f32.xlu0 %v24_v2  ;;  %188 = vmatpush3.bf16.msra.mxu0 %v201_v14  ;;  %v170_v27 = vld [vmem:[%s281_s1] ss:$0 sm:$0xff] }
   0x4   :  { %189 = vmatprep.subr.bf16.mxu0 %v209_v15  ;;  %v171_v31 = vld [vmem:[%s282_s2] ss:$0 sm:$0xff] }
   0x5   :  { %v172_v36 = vld [vmem:[%s283_s4] ss:$0 sm:$0xff] }
   0x7   :  { %28 = vadd.xlane.f32.xlu0 %v27_v3  ;;  %190 = vmatpush3.bf16.msra.mxu0 %v202_v16 }
   0x8   :  { %191 = vmatprep.subr.bf16.mxu0 %v209_v15 }
   0xb   :  { %192 = vmatpush3.bf16.msra.mxu0 %v203_v17 }
   0xc   :  { %193 = vmatprep.subr.bf16.mxu0 %v209_v15 }
   0xf   :  { %194 = vmatpush3.bf16.msra.mxu0 %v204_v18 }
  0x90   :  { %v26_v4 = vpop.xlane.xlu0 %25 }
  0x91   :  { %v31_v5 = vmul.f32 0.015625, %v26_v4 }
  0x93   :  { %v33_v6 = vsub.f32 %v21_v0, %v31_v5 }
  0x94   :  { %v29_v7 = vpop.xlane.xlu0 %28 }
  0x95   :  { %v32_v8 = vmul.f32 0.015625, %v29_v7  ;;  %v35_v9 = vmul.f32 %v33_v6, %v33_v6 }
  0x97   :  { %v34_v10 = vsub.f32 %v22_v1, %v32_v8  ;;  %v37_v11 = vsel %vm23_vm0, %v35_v9, 0.0 }
  0x98   :  { %38 = vadd.xlane.f32.xlu1 %v37_v11 }
  0x99   :  { %v36_v12 = vmul.f32 %v34_v10, %v34_v10 }
  0x9b   :  { %v40_v13 = vsel %vm23_vm0, %v36_v12, 0.0 }
  0x9c   :  { %41 = vadd.xlane.f32.xlu1 %v40_v13 }
 0x125   :  { %v39_v19 = vpop.xlane.xlu1 %38 }
 0x126   :  { %v43_v20 = vmul.f32 0.015625, %v39_v19 }
 0x128   :  { %v45_v21 = vadd.f32 1e-05, %v43_v20 }
 0x129   :  { %v42_v22 = vpop.xlane.xlu1 %41 }
 0x12a   :  { %205 = vrsqrt.f32 %v45_v21  ;;  %v44_v23 = vmul.f32 0.015625, %v42_v22 }
 0x12c   :  { %v46_v24 = vadd.f32 1e-05, %v44_v23 }
 0x12e   :  { %207 = vrsqrt.f32 %v46_v24 }
 0x134   :  { %v206_v25 = vpop.eup %205 }
 0x135   :  { %v49_v26 = vmul.f32 %v206_v25, %v33_v6 }
 0x137   :  { %v58_v30 = vmul.f32 %v170_v27, %v49_v26 }
 0x138   :  { %v208_v28 = vpop.eup %207 }
 0x139   :  { %v50_v29 = vmul.f32 %v208_v28, %v34_v10  ;;  %v67_v33 = vadd.f32 %v171_v31, %v58_v30 }
 0x13b   :  { %v59_v32 = vmul.f32 %v170_v27, %v50_v29 }
 0x13d   :  { %v68_v34 = vadd.f32 %v171_v31, %v59_v32 }
 0x13f   :  { %v69_v35 = vpack.c.bf16 %v68_v34, %v67_v33 }
 0x141   :  { %196 = vmatmul.mubr.msk.bf16.vlgmr.msra.gmra.mrb[0].mxu0 %vm23_vm0, %v69_v35 }
 0x214   :  { %v146_v37 = vpop.f32.mrb[0].mxu0 }
 0x215   :  { %v147_v38 = vadd.f32 %v172_v36, %v146_v37  ;;  %v197_v39 = vpop.f32.mrb[1].mxu0 }
 0x216   :  { %v149_v40 = vpop.f32.mrb[2].mxu0 }
 0x217   :  { %v153_v41 = vmax.f32 %v147_v38, 0.0  ;;  %v150_v42 = vadd.f32 %v172_v36, %v149_v40  ;;  %v198_v43 = vpop.f32.mrb[3].mxu0 }
 0x219   :  { %v180_v44 = vpack.c.bf16 %v153_v41, %v153_v41  ;;  %v154_v45 = vmax.f32 %v150_v42, 0.0 }
 0x21b   :  { %164 = vst.msk [vmem:[%s284_s5] sm:$0xf] %vm163_vm2, %v180_v44  ;;  %v181_v46 = vpack.c.bf16 %v154_v45, %v154_v45 }
 0x21d   :  { %165 = vst.msk [vmem:[%s284_s5 + $0x4] sm:$0xf] %vm163_vm2, %v181_v46 }

// kernel: decoder_transformer_forward.25
= control target key start
LH: loop header
LB: loop body
LE: loop exit
PB: predicated region body
PF: predicated region fallthrough
CT: control target
= control target key end

     0   :  { %s963_s15 = smov 0   ;;  %s1051_s0 = inlined_call_operand.vmem [shape: bf16[2,4,8,16], index: 0, kind: input, shape index: {}]   ;;  %s1052_s1 = inlined_call_operand.vmem [shape: bf16[2,4,8,16], index: 1, kind: input, shape index: {}]   ;;  %s1053_s2 = inlined_call_operand.vmem [shape: bf16[2,4,8,16], index: 2, kind: input, shape index: {}]   ;;  %s1054_s3 = inlined_call_operand.vmem [shape: f32[2,1,8], index: 3, kind: input, shape index: {}]   ;;  %s1055_s4 = inlined_call_operand.vmem [shape: bf16[2,4,8,16], index: 4, kind: output, shape index: {}]  }
   0x1 LB: > { %s808_s16 = sadd.s32 4294967295, %s933_s15   ;;  %p812_p0 = scmp.ge.s32.totalorder %s933_s15, 1  ;;  %s933_s15 = sphi %s963_s15, %s14_s15  }
   0x2   : > { %p190_p1 = scmp.lt.s32.totalorder %s933_s15, 3 }
   0x4   : > { %p191_p2 = pnand %p812_p0, %p190_p1 }
   0x5   : > { %p229_p3 = scmp.lt.s32.totalorder (!%p191_p2), %s808_s16, 1  ;;  %v935_v0 = vmov (!%p191_p2), 0.0   ;;  %vm936_vm0 = vmmov (!%p191_p2), 0   ;;  %vm272_vm1 = vcmask (!%p191_p2), 130048   ;;  %vm457_vm2 = vcmask (!%p191_p2), 64512  }
   0x6   : > { %194 = sbr.rel (%p191_p2) target bundleno = 787 (0x313), region = 36  ;;  %852 = vmatprep.subr.bf16.mxu0 (!%p191_p2), %v935_v0  ;;  %858 = vmatprep.subr.bf16.mxu1 (!%p191_p2), %v935_v0  ;;  %vm937_vm4 = vmmov (!%p191_p2), 1   ;;  %vm529_vm12 = vcmask (!%p191_p2), 1043456  }
   0x7   : > { %854 = vmatprep.mubr.msk.bf16.mxu0 (!%p191_p2), %vm936_vm0, %v935_v0  ;;  %860 = vmatprep.mubr.msk.bf16.mxu1 (!%p191_p2), %vm936_vm0, %v935_v0 }
   0xd   : > { %s1057_s16 = smov (!%p229_p3, %s808_s16), 1 }
   0xe   : > { %s980_s17 = sshll.u32 %s1057_s16, 4  ;;  %s246_s26 = scalar_lea.vmem %s1054_s3, %s1057_s16 }
   0xf   : > { %s238_s20 = scalar_lea.vmem %s1052_s1, %s980_s17  ;;  %s233_s23 = scalar_lea.vmem %s1051_s0, %s980_s17  ;;  %v821_v13 = vld [vmem:[%s246_s26] ss:$0 sm:$0xff] }
  0x10   : > { %v257_v1 = vld [vmem:[%s238_s20] sm:$0xf]  ;;  %v258_v2 = vld [vmem:[%s238_s20 + $0x4] sm:$0xf]  ;;  %v259_v5 = vld [vmem:[%s238_s20 + $0x8] sm:$0xf]  ;;  %s243_s29 = scalar_lea.vmem %s1053_s2, %s980_s17  ;;  %s251_s6 = scalar_lea.vmem %s1055_s4, %s980_s17 }
  0x11   : > { %v277_v3 = vsel %vm272_vm1, %v257_v1, 0  ;;  %v323_v4 = vsel %vm272_vm1, %v258_v2, 0  ;;  %v260_v6 = vld [vmem:[%s238_s20 + $0xc] sm:$0xf]  ;;  %v253_v7 = vld [vmem:[%s233_s23] sm:$0xf] }
  0x12   : > { %853 = vmatpush3.bf16.xpose.msra.mxu0 %v277_v3  ;;  %859 = vmatpush3.bf16.xpose.msra.mxu1 %v323_v4  ;;  %v254_v8 = vld [vmem:[%s233_s23 + $0x4] sm:$0xf]  ;;  %v369_v9 = vsel %vm272_vm1, %v259_v5, 0  ;;  %v415_v10 = vsel %vm272_vm1, %v260_v6, 0  ;;  %v255_v11 = vld [vmem:[%s233_s23 + $0x8] sm:$0xf] }
  0x13   : > { %864 = vmatprep.subr.bf16.mxu0 %v935_v0  ;;  %870 = vmatprep.subr.bf16.mxu1 %v935_v0  ;;  %v256_v12 = vld [vmem:[%s233_s23 + $0xc] sm:$0xf]  ;;  %v261_v62 = vld [vmem:[%s243_s29] sm:$0xf]  ;;  %v262_v1 = vld [vmem:[%s243_s29 + $0x4] sm:$0xf] }
  0x14   : > { %v531_v63 = vsel %vm529_vm12, %v261_v62, 0  ;;  %v577_v2 = vsel %vm529_vm12, %v262_v1, 0  ;;  %v263_v3 = vld [vmem:[%s243_s29 + $0x8] sm:$0xf]  ;;  %v264_v5 = vld [vmem:[%s243_s29 + $0xc] sm:$0xf] }
  0x15   : > { %v623_v4 = vsel %vm529_vm12, %v263_v3, 0  ;;  %v669_v6 = vsel %vm529_vm12, %v264_v5, 0 }
  0x19   : > { %855 = vmatmul.mubr.msk.bf16.vlgmr.msra.gmra.mrb[0].mxu0 %vm272_vm1, %v253_v7  ;;  %861 = vmatmul.mubr.msk.bf16.vlgmr.msra.gmra.mrb[0].mxu1 %vm272_vm1, %v254_v8 }
  0x1a   : > { %865 = vmatpush3.bf16.xpose.msra.mxu0 %v369_v9  ;;  %871 = vmatpush3.bf16.xpose.msra.mxu1 %v415_v10 }
  0x1b   : > { %866 = vmatprep.mubr.msk.bf16.mxu0 %vm936_vm0, %v935_v0  ;;  %872 = vmatprep.mubr.msk.bf16.mxu1 %vm936_vm0, %v935_v0 }
  0x1c   : > { %876 = vmatprep.subr.bf16.mxu0 %v935_v0  ;;  %882 = vmatprep.subr.bf16.mxu1 %v935_v0 }
  0x21   : > { %867 = vmatmul.mubr.msk.bf16.vlgmr.msra.gmra.mrb[4].mxu0 %vm272_vm1, %v255_v11  ;;  %873 = vmatmul.mubr.msk.bf16.vlgmr.msra.gmra.mrb[4].mxu1 %vm272_vm1, %v256_v12 }
  0x22   : > { %878 = vmatprep.mubr.msk.bf16.mxu0 %vm936_vm0, %v935_v0  ;;  %884 = vmatprep.mubr.msk.bf16.mxu1 %vm936_vm0, %v935_v0 }
  0x23   : > { %877 = vmatpush3.bf16.msra.mxu0 %v531_v63  ;;  %883 = vmatpush3.bf16.msra.mxu1 %v577_v2 }
  0x24   : > { %888 = vmatprep.subr.bf16.mxu0 %v935_v0  ;;  %894 = vmatprep.subr.bf16.mxu1 %v935_v0 }
  0xec   : > { %v313_v14 = vpop.f32.mrb[0].mxu0  ;;  %v359_v15 = vpop.f32.mrb[0].mxu1 }
  0xed   : > { %v314_v16 = vadd.f32 %v821_v13, %v313_v14  ;;  %v856_v17 = vpop.f32.mrb[1].mxu0  ;;  %v360_v18 = vadd.f32 %v821_v13, %v359_v15  ;;  %v862_v19 = vpop.f32.mrb[1].mxu1 }
  0xee   : > { %v316_v20 = vpop.f32.mrb[2].mxu0  ;;  %v362_v21 = vpop.f32.mrb[2].mxu1 }
  0xef   : > { %v857_v22 = vpop.f32.mrb[3].mxu0  ;;  %v458_v23 = vsel %vm457_vm2, %v314_v16, -inf  ;;  %v863_v24 = vpop.f32.mrb[3].mxu1  ;;  %v461_v25 = vsel %vm457_vm2, %v360_v18, -inf }
  0xf0   : > { %459 = vmax.xlane.f32.xlu0 %v458_v23 }
  0xf4   : > { %462 = vmax.xlane.f32.xlu0 %v461_v25  ;;  %v405_v26 = vpop.f32.mrb[4].mxu0  ;;  %v451_v27 = vpop.f32.mrb[4].mxu1 }
  0xf5   : > { %v406_v28 = vadd.f32 %v821_v13, %v405_v26  ;;  %v868_v29 = vpop.f32.mrb[5].mxu0  ;;  %v452_v30 = vadd.f32 %v821_v13, %v451_v27  ;;  %v874_v31 = vpop.f32.mrb[5].mxu1 }
  0xf6   : > { %v408_v32 = vpop.f32.mrb[6].mxu0  ;;  %v454_v33 = vpop.f32.mrb[6].mxu1 }
  0xf7   : > { %v869_v34 = vpop.f32.mrb[7].mxu0  ;;  %v464_v35 = vsel %vm457_vm2, %v406_v28, -inf  ;;  %v875_v36 = vpop.f32.mrb[7].mxu1  ;;  %v467_v37 = vsel %vm457_vm2, %v452_v30, -inf }
  0xf8   : > { %465 = vmax.xlane.f32.xlu1 %v464_v35 }
  0xfc   : > { %468 = vmax.xlane.f32.xlu1 %v467_v37 }
 0x17d   : > { %v460_v38 = vpop.xlane.xlu0 %459 }
 0x17e   : > { %vm470_vm3 = vweird.f32 %v460_v38 }
 0x17f   : > { %vm474_vm5 = vmxor %vm470_vm3, %vm937_vm4  ;;  %vm715_vm3 = vcmask 125952  }
 0x180   : > { %v478_v39 = vsel %vm474_vm5, %v460_v38, 0.0 }
 0x181   : > { %v482_v40 = vsub.f32 %v314_v16, %v478_v39  ;;  %v463_v41 = vpop.xlane.xlu0 %462 }
 0x182   : > { %vm471_vm6 = vweird.f32 %v463_v41 }
 0x183   : > { %v486_v42 = vmul.f32 1.442695, %v482_v40  ;;  %vm475_vm7 = vmxor %vm471_vm6, %vm937_vm4 }
 0x184   : > { %v479_v43 = vsel %vm475_vm7, %v463_v41, 0.0 }
 0x185   : > { %911 = vpow2.f32 %v486_v42  ;;  %v483_v44 = vsub.f32 %v360_v18, %v479_v43  ;;  %v466_v45 = vpop.xlane.xlu1 %465 }
 0x186   : > { %vm472_vm8 = vweird.f32 %v466_v45 }
 0x187   : > { %v488_v46 = vmul.f32 1.442695, %v483_v44  ;;  %vm476_vm9 = vmxor %vm472_vm8, %vm937_vm4 }
 0x188   : > { %v480_v47 = vsel %vm476_vm9, %v466_v45, 0.0 }
 0x189   : > { %913 = vpow2.f32 %v488_v46  ;;  %v484_v48 = vsub.f32 %v406_v28, %v480_v47  ;;  %v469_v49 = vpop.xlane.xlu1 %468 }
 0x18a   : > { %vm473_vm10 = vweird.f32 %v469_v49 }
 0x18b   : > { %v490_v50 = vmul.f32 1.442695, %v484_v48  ;;  %vm477_vm11 = vmxor %vm473_vm10, %vm937_vm4 }
 0x18c   : > { %v481_v51 = vsel %vm477_vm11, %v469_v49, 0.0 }
 0x18d   : > { %915 = vpow2.f32 %v490_v50  ;;  %v485_v52 = vsub.f32 %v452_v30, %v481_v51 }
 0x18f   : > { %v912_v53 = vpop.eup %911  ;;  %v492_v54 = vmul.f32 1.442695, %v485_v52 }
 0x190   : > { %v494_v55 = vsel %vm457_vm2, %v912_v53, 0.0 }
 0x191   : > { %917 = vpow2.f32 %v492_v54  ;;  %495 = vadd.xlane.f32.xlu0 %v494_v55 }
 0x193   : > { %v914_v56 = vpop.eup %913 }
 0x194   : > { %v497_v57 = vsel %vm457_vm2, %v914_v56, 0.0 }
 0x195   : > { %498 = vadd.xlane.f32.xlu1 %v497_v57 }
 0x197   : > { %v916_v58 = vpop.eup %915 }
 0x198   : > { %v500_v59 = vsel %vm457_vm2, %v916_v58, 0.0 }
 0x199   : > { %501 = vadd.xlane.f32.xlu0 %v500_v59 }
 0x19b   : > { %v918_v60 = vpop.eup %917 }
 0x19c   : > { %v503_v61 = vsel %vm457_vm2, %v918_v60, 0.0 }
 0x19d   : > { %504 = vadd.xlane.f32.xlu1 %v503_v61 }
 0x21e   : > { %v496_v7 = vpop.xlane.xlu0 %495 }
 0x21f   : > { %vm506_vm13 = vcmp.eq.f32.partialorder %v496_v7, 0.0 }
 0x220   : > { %v510_v8 = vsel %vm506_vm13, 1.0, %v496_v7 }
 0x221   : > { %919 = vrcp.f32 %v510_v8 }
 0x222   : > { %v499_v9 = vpop.xlane.xlu1 %498 }
 0x223   : > { %vm507_vm14 = vcmp.eq.f32.partialorder %v499_v9, 0.0 }
 0x224   : > { %v511_v10 = vsel %vm507_vm14, 1.0, %v499_v9 }
 0x225   : > { %921 = vrcp.f32 %v511_v10 }
 0x226   : > { %v502_v11 = vpop.xlane.xlu0 %501 }
 0x227   : > { %vm508_vm15 = vcmp.eq.f32.partialorder %v502_v11, 0.0 }
 0x228   : > { %v512_v12 = vsel %vm508_vm15, 1.0, %v502_v11 }
 0x229   : > { %923 = vrcp.f32 %v512_v12 }
 0x22a   : > { %v505_v13 = vpop.xlane.xlu1 %504 }
 0x22b   : > { %v920_v14 = vpop.eup %919  ;;  %vm509_vm1 = vcmp.eq.f32.partialorder %v505_v13, 0.0 }
 0x22c   : > { %v513_v15 = vsel %vm509_vm1, 1.0, %v505_v13  ;;  %v518_v16 = vmul.f32 %v920_v14, %v912_v53 }
 0x22d   : > { %925 = vrcp.f32 %v513_v15 }
 0x22e   : > { %v522_v17 = vpack.c.bf16 %v518_v16, %v518_v16 }
 0x22f   : > { %v922_v18 = vpop.eup %921 }
 0x230   : > { %879 = vmatmul.mubr.msk.bf16.vlgmr.msra.gmra.mrb[8].mxu0 %vm457_vm2, %v522_v17  ;;  %v519_v19 = vmul.f32 %v922_v18, %v914_v56 }
 0x231   : > { %889 = vmatpush3.bf16.msra.mxu0 %v623_v4  ;;  %890 = vmatprep.mubr.msk.bf16.mxu0 %vm936_vm0, %v935_v0 }
 0x232   : > { %v523_v20 = vpack.c.bf16 %v519_v19, %v519_v19 }
 0x233   : > { %v924_v21 = vpop.eup %923 }
 0x234   : > { %v520_v22 = vmul.f32 %v924_v21, %v916_v58  ;;  %885 = vmatmul.mubr.msk.bf16.vlgmr.msra.gmra.mrb[8].mxu1 %vm457_vm2, %v523_v20 }
 0x235   : > { %895 = vmatpush3.bf16.msra.mxu1 %v669_v6  ;;  %896 = vmatprep.mubr.msk.bf16.mxu1 %vm936_vm0, %v935_v0 }
 0x236   : > { %v524_v23 = vpack.c.bf16 %v520_v22, %v520_v22 }
 0x237   : > { %v926_v24 = vpop.eup %925 }
 0x238   : > { %v521_v25 = vmul.f32 %v926_v24, %v918_v60  ;;  %891 = vmatmul.mubr.msk.bf16.vlgmr.msra.gmra.mrb[12].mxu0 %vm457_vm2, %v524_v23 }
 0x23a   : > { %v525_v26 = vpack.c.bf16 %v521_v25, %v521_v25 }
 0x23c   : > { %897 = vmatmul.mubr.msk.bf16.vlgmr.msra.gmra.mrb[12].mxu1 %vm457_vm2, %v525_v26 }
 0x303   : > { %v567_v27 = vpop.f32.mrb[8].mxu0 }
 0x304   : > { %v711_v28 = vpack.c.bf16 %v567_v27, %v567_v27  ;;  %v880_v29 = vpop.f32.mrb[9].mxu0 }
 0x305   : > { %v570_v30 = vpop.f32.mrb[10].mxu0 }
 0x306   : > { %716 = vst.msk [vmem:[%s251_s6] sm:$0xf] %vm715_vm3, %v711_v28  ;;  %v881_v0 = vpop.f32.mrb[11].mxu0 }
 0x307   : > { %v613_v31 = vpop.f32.mrb[8].mxu1 }
 0x308   : > { %v712_v32 = vpack.c.bf16 %v613_v31, %v613_v31  ;;  %v886_v33 = vpop.f32.mrb[9].mxu1 }
 0x309   : > { %v616_v34 = vpop.f32.mrb[10].mxu1 }
 0x30a   : > { %717 = vst.msk [vmem:[%s251_s6 + $0x4] sm:$0xf] %vm715_vm3, %v712_v32  ;;  %v887_v35 = vpop.f32.mrb[11].mxu1 }
 0x30b   : > { %v659_v36 = vpop.f32.mrb[12].mxu0 }
 0x30c   : > { %v713_v37 = vpack.c.bf16 %v659_v36, %v659_v36  ;;  %v892_v38 = vpop.f32.mrb[13].mxu0 }
 0x30d   : > { %v662_v39 = vpop.f32.mrb[14].mxu0 }
 0x30e   : > { %718 = vst.msk [vmem:[%s251_s6 + $0x8] sm:$0xf] %vm715_vm3, %v713_v37  ;;  %v893_v40 = vpop.f32.mrb[15].mxu0 }
 0x30f   : > { %v705_v41 = vpop.f32.mrb[12].mxu1 }
 0x310   : > { %v714_v42 = vpack.c.bf16 %v705_v41, %v705_v41  ;;  %v898_v43 = vpop.f32.mrb[13].mxu1 }
 0x311   : > { %v708_v44 = vpop.f32.mrb[14].mxu1 }
 0x312   : > { %719 = vst.msk [vmem:[%s251_s6 + $0xc] sm:$0xf] %vm715_vm3, %v714_v42  ;;  %v899_v45 = vpop.f32.mrb[15].mxu1 }
 0x313 PF: > { %s14_s15 = sadd.s32 1, %s933_s15  }
 0x314   : > { %p11_p4 = scmp.ge.s32.totalorder %s14_s15, 4  }
 0x316   :  { %13 = sbr.rel (!%p11_p4) target bundleno = 1 (0x1), region = 75 }

// kernel: decoder_transformer_forward.37
= control target key start
LH: loop header
LB: loop body
LE: loop exit
PB: predicated region body
PF: predicated region fallthrough
CT: control target
= control target key end

     0   :  { %v155_v0 = vmov 0.0   ;;  %vm156_vm0 = vmmov 0   ;;  %vm26_vm1 = vcmask 252928   ;;  %vm70_vm2 = vcmask 523264   ;;  %s217_s1 = inlined_call_operand.vmem [shape: bf16[64,31], index: 1, kind: input, shape index: {}]   ;;  %s218_s2 = inlined_call_operand.vmem [shape: f32[1,31], index: 2, kind: input, shape index: {}]   ;;  %s219_s0 = inlined_call_operand.vmem [shape: bf16[16,64], index: 0, kind: input, shape index: {}]   ;;  %s220_s3 = inlined_call_operand.vmem [shape: f32[16,31], index: 3, kind: output, shape index: {}]  }
   0x1   :  { %136 = vmatprep.subr.bf16.mxu0 %v155_v0  ;;  %v150_v1 = vld [vmem:[%s217_s1] sm:$0xff]   ;;  %144 = vmatprep.mubr.msk.bf16.mxu0 %vm156_vm0, %v155_v0  ;;  %v151_v2 = vld [vmem:[%s217_s1 + $0x8] sm:$0xff]   ;;  %v152_v4 = vld [vmem:[%s217_s1 + $0x10] sm:$0xff]  }
   0x2   :  { %137 = vmatpush3.bf16.msra.mxu0 %v150_v1  ;;  %v124_v3 = vld [vmem:[%s218_s2] ss:$0 sm:$0xff]  ;;  %v153_v5 = vld [vmem:[%s217_s1 + $0x18] sm:$0xff]  }
   0x3   :  { %138 = vmatprep.subr.bf16.mxu0 %v155_v0  ;;  %27 = vst.msk [vmem:[%s220_s3] sm:$0xff] %vm26_vm1, %v124_v3  ;;  %28 = vst.msk [vmem:[%s220_s3 + $0x8] sm:$0xff] %vm26_vm1, %v124_v3  ;;  %v154_v6 = vld [vmem:[%s219_s0] sm:$0xff]  }
   0x6   :  { %139 = vmatpush3.bf16.msra.mxu0 %v151_v2 }
   0x7   :  { %140 = vmatprep.subr.bf16.mxu0 %v155_v0 }
   0xa   :  { %141 = vmatpush3.bf16.msra.mxu0 %v152_v4  ;;  %v29_v7 = vld [vmem:[%s220_s3] sm:$0xff]  ;;  %v30_v9 = vld [vmem:[%s220_s3 + $0x8] sm:$0xff] }
   0xb   :  { %142 = vmatprep.subr.bf16.mxu0 %v155_v0 }
   0xe   :  { %143 = vmatpush3.bf16.msra.mxu0 %v153_v5 }
  0x11   :  { %145 = vmatmul.mubr.msk.bf16.vlgmr.msra.gmra.mrb[0].mxu0 %vm70_vm2, %v154_v6 }
  0xe4   :  { %v108_v8 = vpop.f32.mrb[0].mxu0 }
  0xe5   :  { %v115_v10 = vadd.f32 %v108_v8, %v29_v7  ;;  %v146_v11 = vpop.f32.mrb[1].mxu0 }
  0xe6   :  { %v111_v12 = vpop.f32.mrb[2].mxu0 }
  0xe7   :  { %118 = vst.msk [vmem:[%s220_s3] sm:$0xff] %vm26_vm1, %v115_v10  ;;  %v116_v13 = vadd.f32 %v111_v12, %v30_v9  ;;  %v147_v14 = vpop.f32.mrb[3].mxu0 }
  0xe9   :  { %119 = vst.msk [vmem:[%s220_s3 + $0x8] sm:$0xff] %vm26_vm1, %v116_v13 }

</bundles_post_ra>
